<compile_context>
chip_gen: v6e
topology: v6e:2x2x1
jax: 0.10.0
libtpu: 0.0.40
codegen_flags: <defaults>
</compile_context>

<pallas_src>
import functools

import jax
import jax.numpy as jnp
from jax import lax
from jax.experimental import pallas as pl
from jax.experimental.pallas import tpu as pltpu

_BN_EPS = 1e-5


# ---------------------------------------------------------------------------
# Fused Pallas kernel
# ---------------------------------------------------------------------------
def _fused_depth_head_kernel(x_ref, w1_ref, b1_ref, m1_ref, kup_ref,
                             w2_ref, b2_ref, m2_ref, o_ref,
                             p1_ref, p2_ref, *, W, W2):
    """conv3x3+BN+ELU -> bilinear x2 (align_corners) -> conv3x3+BN+sigmoid.

    x_ref   : (1, Cin, H*W)      one batch element, spatial flattened on lanes
    w1_ref  : (Cmid, 9*Cin)      bf16 tap-major im2col weights, BN scale folded
    b1_ref  : (Cmid, 1)          folded BN shift, conv1
    m1_ref  : (9, H*W)           0/1 border masks for conv1 taps
    kup_ref : (H*W, H2*W2)       kron(A,B)^T bilinear x2 interp operator
    w2_ref  : (Cout, 9*Cmid)     bf16 tap-major im2col weights, BN scale folded
    b2_ref  : (Cout, 1)          folded BN shift, conv2
    m2_ref  : (9, H2*W2)         0/1 border masks for conv2 taps
    o_ref   : (1, Cout, H2*W2)   lane-dense output
    p1_ref  : (9*Cin, H*W)       bf16 VMEM scratch (conv1 im2col patches)
    p2_ref  : (9*Cmid, H2*W2)    bf16 VMEM scratch (conv2 im2col patches)
    """
    Cin, HW = x_ref.shape[1], x_ref.shape[2]
    Cmid = w1_ref.shape[0]
    Cout, HW2 = o_ref.shape[1], o_ref.shape[2]

    def im2col(feat, masks, p_ref, c, w, hw):
        # feat: (c, hw) f32 lane-dense.  Tap (dy, dx) at flat pixel p is
        # feat[p + (dy-1)*w + (dx-1)] where in-bounds, else 0 (the conv pad).
        # Rolls stay on the XLU; masks zero the wrapped border lanes.
        for dy in range(3):
            for dx in range(3):
                k = dy * 3 + dx
                s = (dy - 1) * w + (dx - 1)
                t = feat if s == 0 else pltpu.roll(feat, shift=(-s) % hw, axis=1)
                if not (dy == 1 and dx == 1):
                    t = t * masks[k][None, :]
                p_ref[pl.ds(k * c, c), :] = t.astype(p_ref.dtype)

    # ---- conv1 (BN scale folded into weights) + shift + ELU ----------------
    x = x_ref[0]                                              # (Cin, HW) f32
    im2col(x, m1_ref[...], p1_ref, Cin, W, HW)
    y1 = jnp.dot(w1_ref[...], p1_ref[...],
                 preferred_element_type=jnp.float32)          # (Cmid, HW)
    y1 = y1 + b1_ref[...]
    # ELU (alpha=1); clamp exp arg so the unselected branch can't overflow.
    y1 = jnp.where(y1 > 0, y1, jnp.exp(jnp.minimum(y1, 0.0)) - 1.0)

    # ---- bilinear x2 upsample (align_corners=True): one matmul, all channels
    u = jnp.dot(y1, kup_ref[...],
                preferred_element_type=jnp.float32)           # (Cmid, HW2)

    # ---- conv2 (BN scale folded into weights) + shift + sigmoid ------------
    im2col(u, m2_ref[...], p2_ref, Cmid, W2, HW2)
    y2 = jnp.dot(w2_ref[...], p2_ref[...],
                 preferred_element_type=jnp.float32)          # (Cout, HW2)
    y2 = y2 + b2_ref[...]
    y2 = 1.0 / (1.0 + jnp.exp(-y2))                           # sigmoid
    o_ref[...] = y2.reshape(1, Cout, HW2).astype(o_ref.dtype)


# ---------------------------------------------------------------------------
# Host-side helpers
# ---------------------------------------------------------------------------
def _interp_matrix(n_in, n_out):
    """Interpolation matrix for bilinear resize with align_corners=True
    (matches torch F.interpolate(scale_factor=2, mode='bilinear',
    align_corners=True))."""
    if n_in == 1:
        return jnp.ones((n_out, 1), jnp.float32)
    src = jnp.arange(n_out, dtype=jnp.float32) * (n_in - 1) / (n_out - 1)
    lo = jnp.clip(jnp.floor(src).astype(jnp.int32), 0, n_in - 2)
    frac = src - lo.astype(jnp.float32)
    return ((1.0 - frac)[:, None] * jax.nn.one_hot(lo, n_in, dtype=jnp.float32)
            + frac[:, None] * jax.nn.one_hot(lo + 1, n_in, dtype=jnp.float32))


def _tap_masks(h, w):
    """(9, h*w) f32 masks: mask[k][p]==1 iff tap k=(dy*3+dx) of a 3x3 conv
    with pad=1 reads an in-bounds pixel at flat output position p."""
    hw = h * w
    idx = jnp.arange(hw, dtype=jnp.int32)
    row, col = idx // w, idx % w
    rows = []
    for dy in range(3):
        for dx in range(3):
            ok = jnp.ones((hw,), bool)
            if dy == 0:
                ok = ok & (row >= 1)
            if dy == 2:
                ok = ok & (row <= h - 2)
            if dx == 0:
                ok = ok & (col >= 1)
            if dx == 2:
                ok = ok & (col <= w - 2)
            rows.append(ok.astype(jnp.float32))
    return jnp.stack(rows)


def init_last_depth_head(key, input_channel, output_channel):
    mid = input_channel // 2
    ks = jax.random.split(key, 12)

    def conv_block(kset, cin, cout):
        kw, kb, kg, kbe, km, kv = kset
        w = 0.1 * jax.random.normal(kw, (cout, cin, 3, 3), jnp.float32)   # OIHW
        b = 0.1 * jax.random.normal(kb, (cout,), jnp.float32)
        gamma = 1.0 + 0.1 * jax.random.normal(kg, (cout,), jnp.float32)
        beta = 0.1 * jax.random.normal(kbe, (cout,), jnp.float32)
        mean = 0.1 * jax.random.normal(km, (cout,), jnp.float32)
        var = 1.0 + 0.1 * jnp.abs(jax.random.normal(kv, (cout,), jnp.float32))
        # folded BN (eval mode): y = scale * conv(x) + shift
        scale = gamma / jnp.sqrt(var + _BN_EPS)
        shift = (b - mean) * scale + beta
        # tap-major im2col weights (co, (dy,dx,ci)); BN scale folded in, bf16.
        w_mat = jnp.transpose(w, (0, 2, 3, 1)).reshape(cout, 9 * cin)
        w_mat_bf16 = (w_mat * scale[:, None]).astype(jnp.bfloat16)
        return dict(w_oihw=w, bias=b, gamma=gamma, beta=beta, mean=mean,
                    var=var, w_mat_bf16=w_mat_bf16,
                    shift2d=shift.reshape(cout, 1))

    return dict(conv1=conv_block(ks[0:6], input_channel, mid),
                conv2=conv_block(ks[6:12], mid, output_channel))


def last_depth_head_forward(x_nchw, params):
    """Public forward: NCHW in, NCHW out (matches the PyTorch module)."""
    N, Cin, H, W = x_nchw.shape
    c1, c2 = params["conv1"], params["conv2"]
    Cmid = c1["w_mat_bf16"].shape[0]
    Cout = c2["w_mat_bf16"].shape[0]
    H2, W2 = 2 * H, 2 * W
    HW, HW2 = H * W, H2 * W2

    # bilinear x2 operator on the flattened-spatial layout: kron(A, B)^T
    a = _interp_matrix(H, H2)            # (H2, H)
    b = _interp_matrix(W, W2)            # (W2, W)
    kup = jnp.kron(a, b).T               # (HW, HW2), f32
    m1 = _tap_masks(H, W)                # (9, HW)
    m2 = _tap_masks(H2, W2)              # (9, HW2)

    x_flat = x_nchw.reshape(N, Cin, HW)  # contiguous -> free reshape

    kernel = functools.partial(_fused_depth_head_kernel, W=W, W2=W2)

    out_flat = pl.pallas_call(
        kernel,
        out_shape=jax.ShapeDtypeStruct((N, Cout, HW2), jnp.float32),
        grid=(N,),
        in_specs=[
            pl.BlockSpec((1, Cin, HW), lambda bi: (bi, 0, 0)),
            pl.BlockSpec((Cmid, 9 * Cin), lambda bi: (0, 0)),
            pl.BlockSpec((Cmid, 1), lambda bi: (0, 0)),
            pl.BlockSpec((9, HW), lambda bi: (0, 0)),
            pl.BlockSpec((HW, HW2), lambda bi: (0, 0)),
            pl.BlockSpec((Cout, 9 * Cmid), lambda bi: (0, 0)),
            pl.BlockSpec((Cout, 1), lambda bi: (0, 0)),
            pl.BlockSpec((9, HW2), lambda bi: (0, 0)),
        ],
        out_specs=pl.BlockSpec((1, Cout, HW2), lambda bi: (bi, 0, 0)),
        scratch_shapes=[
            pltpu.VMEM((9 * Cin, HW), jnp.bfloat16),
            pltpu.VMEM((9 * Cmid, HW2), jnp.bfloat16),
        ],
        compiler_params=pltpu.CompilerParams(
            dimension_semantics=("parallel",),
            vmem_limit_bytes=32 * 1024 * 1024),
    )(x_flat, c1["w_mat_bf16"], c1["shift2d"], m1, kup,
      c2["w_mat_bf16"], c2["shift2d"], m2)

    # free reshape (contiguous) back to NCHW
    return out_flat.reshape(N, Cout, H2, W2)


# ---------------------------------------------------------------------------
# Pure-JAX reference (independent path: unfused BN, lax.conv, einsum upsample)
# ---------------------------------------------------------------------------
def _ref_forward(x_nchw, params):
    def conv_bn(x, p, act):
        y = lax.conv_general_dilated(
            x, p["w_oihw"], window_strides=(1, 1), padding=((1, 1), (1, 1)),
            dimension_numbers=("NCHW", "OIHW", "NCHW"))
        y = y + p["bias"][None, :, None, None]
        scale = p["gamma"] / jnp.sqrt(p["var"] + _BN_EPS)
        y = ((y - p["mean"][None, :, None, None]) * scale[None, :, None, None]
             + p["beta"][None, :, None, None])
        if act == "elu":
            return jnp.where(y > 0, y, jnp.exp(jnp.minimum(y, 0.0)) - 1.0)
        return jax.nn.sigmoid(y)

    x = conv_bn(x_nchw, params["conv1"], "elu")
    _, _, H, W = x.shape
    a = _interp_matrix(H, 2 * H)
    b = _interp_matrix(W, 2 * W)
    x = jnp.einsum("oh,nchw->ncow", a, x)
    x = jnp.einsum("pw,nchw->nchp", b, x)
    return conv_bn(x, params["conv2"], "sigmoid")


# ---------------------------------------------------------------------------
if __name__ == "__main__":
    key = jax.random.PRNGKey(0)
    k_x, k_p = jax.random.split(key)

    N, Cin, H, W = 2, 8, 16, 16          # input_channel=8 -> mid=4
    Cout = 1

    x = jax.random.normal(k_x, (N, Cin, H, W), jnp.float32)    # NCHW like torch
    params = init_last_depth_head(k_p, Cin, Cout)

    out = jax.block_until_ready(last_depth_head_forward(x, params))
    assert out.shape == (N, Cout, 2 * H, 2 * W), out.shape

    ref = jax.block_until_ready(_ref_forward(x, params))
    err = float(jnp.max(jnp.abs(out - ref)))
    # bf16 MXU operands vs pure-f32 reference -> allow a small absolute slack.
    if err > 3e-2:
        raise AssertionError(f"Pallas result mismatch vs reference: max|err|={err}")

    print("KERNEL_OK")
</pallas_src>

<mosaic_0001>
module attributes {stable_mosaic.version = 11 : i64} {
  func.func @_fused_depth_head_kernel(%arg0: i32, %arg1: memref<1x8x256xf32, #tpu.memory_space<vmem>>, %arg2: memref<4x72xbf16, #tpu.memory_space<vmem>>, %arg3: memref<4x1xf32, #tpu.memory_space<vmem>>, %arg4: memref<9x256xf32, #tpu.memory_space<vmem>>, %arg5: memref<256x1024xf32, #tpu.memory_space<vmem>>, %arg6: memref<1x36xbf16, #tpu.memory_space<vmem>>, %arg7: memref<1x1xf32, #tpu.memory_space<vmem>>, %arg8: memref<9x1024xf32, #tpu.memory_space<vmem>>, %arg9: memref<1x1x1024xf32, #tpu.memory_space<vmem>>, %arg10: memref<72x256xbf16, #tpu.memory_space<vmem>>, %arg11: memref<36x1024xbf16, #tpu.memory_space<vmem>>) attributes {dimension_semantics = [#tpu.dimension_semantics<parallel>], iteration_bounds = array<i64: 2>, scalar_prefetch = 0 : i64, scratch_operands = 2 : i64, tpu.core_type = #tpu.core_type<tc>, window_params = [{transform_indices = @transform_0, window_bounds = array<i64: 1, 8, 256>}, {pipeline_mode = #tpu.pipeline_mode<synchronous>, transform_indices = @transform_1, window_bounds = array<i64: 4, 72>}, {pipeline_mode = #tpu.pipeline_mode<synchronous>, transform_indices = @transform_2, window_bounds = array<i64: 4, 1>}, {pipeline_mode = #tpu.pipeline_mode<synchronous>, transform_indices = @transform_3, window_bounds = array<i64: 9, 256>}, {pipeline_mode = #tpu.pipeline_mode<synchronous>, transform_indices = @transform_4, window_bounds = array<i64: 256, 1024>}, {pipeline_mode = #tpu.pipeline_mode<synchronous>, transform_indices = @transform_5, window_bounds = array<i64: 1, 36>}, {pipeline_mode = #tpu.pipeline_mode<synchronous>, transform_indices = @transform_6, window_bounds = array<i64: 1, 1>}, {pipeline_mode = #tpu.pipeline_mode<synchronous>, transform_indices = @transform_7, window_bounds = array<i64: 9, 1024>}, {transform_indices = @transform_8, window_bounds = array<i64: 1, 1, 1024>}]} {
    %c0 = arith.constant 0 : index
    %c0_0 = arith.constant 0 : index
    %c0_1 = arith.constant 0 : index
    %0 = vector.load %arg1[%c0, %c0_0, %c0_1] : memref<1x8x256xf32, #tpu.memory_space<vmem>>, vector<1x8x256xf32>
    %1 = vector.shape_cast %0 : vector<1x8x256xf32> to vector<8x256xf32>
    %c0_2 = arith.constant 0 : index
    %c0_3 = arith.constant 0 : index
    %2 = vector.load %arg4[%c0_2, %c0_3] : memref<9x256xf32, #tpu.memory_space<vmem>>, vector<9x256xf32>
    %c17_i32 = arith.constant 17 : i32
    %3 = tpu.dynamic_rotate %1 by %c17_i32 dim 1 : vector<8x256xf32>, i32 -> vector<8x256xf32>
    %4 = vector.extract_strided_slice %2 {offsets = [0, 0], sizes = [1, 256], strides = [1, 1]} : vector<9x256xf32> to vector<1x256xf32>
    %5 = vector.shape_cast %4 : vector<1x256xf32> to vector<256xf32>
    %6 = vector.shape_cast %5 : vector<256xf32> to vector<1x256xf32>
    %7 = vector.broadcast %6 : vector<1x256xf32> to vector<8x256xf32>
    %8 = arith.mulf %3, %7 : vector<8x256xf32>
    %9 = arith.truncf %8 : vector<8x256xf32> to vector<8x256xbf16>
    %c0_4 = arith.constant 0 : index
    %c0_5 = arith.constant 0 : index
    %10 = vector.load %arg10[%c0_4, %c0_5] : memref<72x256xbf16, #tpu.memory_space<vmem>>, vector<8x256xbf16>
    tpu.vector_store %arg10[%c0_4, %c0_5], %9 {strides = array<i32>} : memref<72x256xbf16, #tpu.memory_space<vmem>>, vector<8x256xbf16>,
    %c16_i32 = arith.constant 16 : i32
    %11 = tpu.dynamic_rotate %1 by %c16_i32 dim 1 : vector<8x256xf32>, i32 -> vector<8x256xf32>
    %12 = vector.extract_strided_slice %2 {offsets = [1, 0], sizes = [1, 256], strides = [1, 1]} : vector<9x256xf32> to vector<1x256xf32>
    %13 = vector.shape_cast %12 : vector<1x256xf32> to vector<256xf32>
    %14 = vector.shape_cast %13 : vector<256xf32> to vector<1x256xf32>
    %15 = vector.broadcast %14 : vector<1x256xf32> to vector<8x256xf32>
    %16 = arith.mulf %11, %15 : vector<8x256xf32>
    %17 = arith.truncf %16 : vector<8x256xf32> to vector<8x256xbf16>
    %c8 = arith.constant 8 : index
    %c0_6 = arith.constant 0 : index
    %18 = vector.load %arg10[%c8, %c0_6] : memref<72x256xbf16, #tpu.memory_space<vmem>>, vector<8x256xbf16>
    tpu.vector_store %arg10[%c8, %c0_6], %17 {strides = array<i32>} : memref<72x256xbf16, #tpu.memory_space<vmem>>, vector<8x256xbf16>,
    %c15_i32 = arith.constant 15 : i32
    %19 = tpu.dynamic_rotate %1 by %c15_i32 dim 1 : vector<8x256xf32>, i32 -> vector<8x256xf32>
    %20 = vector.extract_strided_slice %2 {offsets = [2, 0], sizes = [1, 256], strides = [1, 1]} : vector<9x256xf32> to vector<1x256xf32>
    %21 = vector.shape_cast %20 : vector<1x256xf32> to vector<256xf32>
    %22 = vector.shape_cast %21 : vector<256xf32> to vector<1x256xf32>
    %23 = vector.broadcast %22 : vector<1x256xf32> to vector<8x256xf32>
    %24 = arith.mulf %19, %23 : vector<8x256xf32>
    %25 = arith.truncf %24 : vector<8x256xf32> to vector<8x256xbf16>
    %c16 = arith.constant 16 : index
    %c0_7 = arith.constant 0 : index
    %26 = vector.load %arg10[%c16, %c0_7] : memref<72x256xbf16, #tpu.memory_space<vmem>>, vector<8x256xbf16>
    tpu.vector_store %arg10[%c16, %c0_7], %25 {strides = array<i32>} : memref<72x256xbf16, #tpu.memory_space<vmem>>, vector<8x256xbf16>,
    %c1_i32 = arith.constant 1 : i32
    %27 = tpu.dynamic_rotate %1 by %c1_i32 dim 1 : vector<8x256xf32>, i32 -> vector<8x256xf32>
    %28 = vector.extract_strided_slice %2 {offsets = [3, 0], sizes = [1, 256], strides = [1, 1]} : vector<9x256xf32> to vector<1x256xf32>
    %29 = vector.shape_cast %28 : vector<1x256xf32> to vector<256xf32>
    %30 = vector.shape_cast %29 : vector<256xf32> to vector<1x256xf32>
    %31 = vector.broadcast %30 : vector<1x256xf32> to vector<8x256xf32>
    %32 = arith.mulf %27, %31 : vector<8x256xf32>
    %33 = arith.truncf %32 : vector<8x256xf32> to vector<8x256xbf16>
    %c24 = arith.constant 24 : index
    %c0_8 = arith.constant 0 : index
    %34 = vector.load %arg10[%c24, %c0_8] : memref<72x256xbf16, #tpu.memory_space<vmem>>, vector<8x256xbf16>
    tpu.vector_store %arg10[%c24, %c0_8], %33 {strides = array<i32>} : memref<72x256xbf16, #tpu.memory_space<vmem>>, vector<8x256xbf16>,
    %35 = arith.truncf %1 : vector<8x256xf32> to vector<8x256xbf16>
    %c32 = arith.constant 32 : index
    %c0_9 = arith.constant 0 : index
    %36 = vector.load %arg10[%c32, %c0_9] : memref<72x256xbf16, #tpu.memory_space<vmem>>, vector<8x256xbf16>
    tpu.vector_store %arg10[%c32, %c0_9], %35 {strides = array<i32>} : memref<72x256xbf16, #tpu.memory_space<vmem>>, vector<8x256xbf16>,
    %c255_i32 = arith.constant 255 : i32
    %37 = tpu.dynamic_rotate %1 by %c255_i32 dim 1 : vector<8x256xf32>, i32 -> vector<8x256xf32>
    %38 = vector.extract_strided_slice %2 {offsets = [5, 0], sizes = [1, 256], strides = [1, 1]} : vector<9x256xf32> to vector<1x256xf32>
    %39 = vector.shape_cast %38 : vector<1x256xf32> to vector<256xf32>
    %40 = vector.shape_cast %39 : vector<256xf32> to vector<1x256xf32>
    %41 = vector.broadcast %40 : vector<1x256xf32> to vector<8x256xf32>
    %42 = arith.mulf %37, %41 : vector<8x256xf32>
    %43 = arith.truncf %42 : vector<8x256xf32> to vector<8x256xbf16>
    %c40 = arith.constant 40 : index
    %c0_10 = arith.constant 0 : index
    %44 = vector.load %arg10[%c40, %c0_10] : memref<72x256xbf16, #tpu.memory_space<vmem>>, vector<8x256xbf16>
    tpu.vector_store %arg10[%c40, %c0_10], %43 {strides = array<i32>} : memref<72x256xbf16, #tpu.memory_space<vmem>>, vector<8x256xbf16>,
    %c241_i32 = arith.constant 241 : i32
    %45 = tpu.dynamic_rotate %1 by %c241_i32 dim 1 : vector<8x256xf32>, i32 -> vector<8x256xf32>
    %46 = vector.extract_strided_slice %2 {offsets = [6, 0], sizes = [1, 256], strides = [1, 1]} : vector<9x256xf32> to vector<1x256xf32>
    %47 = vector.shape_cast %46 : vector<1x256xf32> to vector<256xf32>
    %48 = vector.shape_cast %47 : vector<256xf32> to vector<1x256xf32>
    %49 = vector.broadcast %48 : vector<1x256xf32> to vector<8x256xf32>
    %50 = arith.mulf %45, %49 : vector<8x256xf32>
    %51 = arith.truncf %50 : vector<8x256xf32> to vector<8x256xbf16>
    %c48 = arith.constant 48 : index
    %c0_11 = arith.constant 0 : index
    %52 = vector.load %arg10[%c48, %c0_11] : memref<72x256xbf16, #tpu.memory_space<vmem>>, vector<8x256xbf16>
    tpu.vector_store %arg10[%c48, %c0_11], %51 {strides = array<i32>} : memref<72x256xbf16, #tpu.memory_space<vmem>>, vector<8x256xbf16>,
    %c240_i32 = arith.constant 240 : i32
    %53 = tpu.dynamic_rotate %1 by %c240_i32 dim 1 : vector<8x256xf32>, i32 -> vector<8x256xf32>
    %54 = vector.extract_strided_slice %2 {offsets = [7, 0], sizes = [1, 256], strides = [1, 1]} : vector<9x256xf32> to vector<1x256xf32>
    %55 = vector.shape_cast %54 : vector<1x256xf32> to vector<256xf32>
    %56 = vector.shape_cast %55 : vector<256xf32> to vector<1x256xf32>
    %57 = vector.broadcast %56 : vector<1x256xf32> to vector<8x256xf32>
    %58 = arith.mulf %53, %57 : vector<8x256xf32>
    %59 = arith.truncf %58 : vector<8x256xf32> to vector<8x256xbf16>
    %c56 = arith.constant 56 : index
    %c0_12 = arith.constant 0 : index
    %60 = vector.load %arg10[%c56, %c0_12] : memref<72x256xbf16, #tpu.memory_space<vmem>>, vector<8x256xbf16>
    tpu.vector_store %arg10[%c56, %c0_12], %59 {strides = array<i32>} : memref<72x256xbf16, #tpu.memory_space<vmem>>, vector<8x256xbf16>,
    %c239_i32 = arith.constant 239 : i32
    %61 = tpu.dynamic_rotate %1 by %c239_i32 dim 1 : vector<8x256xf32>, i32 -> vector<8x256xf32>
    %62 = vector.extract_strided_slice %2 {offsets = [8, 0], sizes = [1, 256], strides = [1, 1]} : vector<9x256xf32> to vector<1x256xf32>
    %63 = vector.shape_cast %62 : vector<1x256xf32> to vector<256xf32>
    %64 = vector.shape_cast %63 : vector<256xf32> to vector<1x256xf32>
    %65 = vector.broadcast %64 : vector<1x256xf32> to vector<8x256xf32>
    %66 = arith.mulf %61, %65 : vector<8x256xf32>
    %67 = arith.truncf %66 : vector<8x256xf32> to vector<8x256xbf16>
    %c64 = arith.constant 64 : index
    %c0_13 = arith.constant 0 : index
    %68 = vector.load %arg10[%c64, %c0_13] : memref<72x256xbf16, #tpu.memory_space<vmem>>, vector<8x256xbf16>
    tpu.vector_store %arg10[%c64, %c0_13], %67 {strides = array<i32>} : memref<72x256xbf16, #tpu.memory_space<vmem>>, vector<8x256xbf16>,
    %c0_14 = arith.constant 0 : index
    %c0_15 = arith.constant 0 : index
    %69 = vector.load %arg2[%c0_14, %c0_15] : memref<4x72xbf16, #tpu.memory_space<vmem>>, vector<4x72xbf16>
    %c0_16 = arith.constant 0 : index
    %c0_17 = arith.constant 0 : index
    %70 = vector.load %arg10[%c0_16, %c0_17] : memref<72x256xbf16, #tpu.memory_space<vmem>>, vector<72x256xbf16>
    %cst = arith.constant dense<0.000000e+00> : vector<4x256xf32>
    %71 = tpu.matmul %69, %70, %cst {dimension_numbers = #tpu.dot_dimension_numbers<[1], [0], [0], [1], [0, 0, 1, 1], [], []>} : vector<4x72xbf16>, vector<72x256xbf16>, vector<4x256xf32> -> vector<4x256xf32>
    %c0_18 = arith.constant 0 : index
    %c0_19 = arith.constant 0 : index
    %72 = vector.load %arg3[%c0_18, %c0_19] : memref<4x1xf32, #tpu.memory_space<vmem>>, vector<4x1xf32>
    %73 = vector.broadcast %72 : vector<4x1xf32> to vector<4x256xf32>
    %74 = arith.addf %71, %73 : vector<4x256xf32>
    %cst_20 = arith.constant 0.000000e+00 : f32
    %75 = vector.broadcast %cst_20 : f32 to vector<4x256xf32>
    %76 = arith.cmpf ogt, %74, %75 : vector<4x256xf32>
    %cst_21 = arith.constant 0.000000e+00 : f32
    %77 = vector.broadcast %cst_21 : f32 to vector<4x256xf32>
    %78 = arith.minimumf %74, %77 : vector<4x256xf32>
    %79 = math.exp %78 : vector<4x256xf32>
    %cst_22 = arith.constant 1.000000e+00 : f32
    %80 = vector.broadcast %cst_22 : f32 to vector<4x256xf32>
    %81 = arith.subf %79, %80 : vector<4x256xf32>
    %82 = arith.select %76, %74, %81 : vector<4x256xi1>, vector<4x256xf32>
    %c0_23 = arith.constant 0 : index
    %c0_24 = arith.constant 0 : index
    %83 = vector.load %arg5[%c0_23, %c0_24] : memref<256x1024xf32, #tpu.memory_space<vmem>>, vector<256x1024xf32>
    %cst_25 = arith.constant dense<0.000000e+00> : vector<4x1024xf32>
    %84 = tpu.matmul %82, %83, %cst_25 {dimension_numbers = #tpu.dot_dimension_numbers<[1], [0], [0], [1], [0, 0, 1, 1], [], []>} : vector<4x256xf32>, vector<256x1024xf32>, vector<4x1024xf32> -> vector<4x1024xf32>
    %c0_26 = arith.constant 0 : index
    %c0_27 = arith.constant 0 : index
    %85 = vector.load %arg8[%c0_26, %c0_27] : memref<9x1024xf32, #tpu.memory_space<vmem>>, vector<9x1024xf32>
    %c33_i32 = arith.constant 33 : i32
    %86 = tpu.dynamic_rotate %84 by %c33_i32 dim 1 : vector<4x1024xf32>, i32 -> vector<4x1024xf32>
    %87 = vector.extract_strided_slice %85 {offsets = [0, 0], sizes = [1, 1024], strides = [1, 1]} : vector<9x1024xf32> to vector<1x1024xf32>
    %88 = vector.shape_cast %87 : vector<1x1024xf32> to vector<1024xf32>
    %89 = vector.shape_cast %88 : vector<1024xf32> to vector<1x1024xf32>
    %90 = vector.broadcast %89 : vector<1x1024xf32> to vector<4x1024xf32>
    %91 = arith.mulf %86, %90 : vector<4x1024xf32>
    %92 = arith.truncf %91 : vector<4x1024xf32> to vector<4x1024xbf16>
    %c0_28 = arith.constant 0 : index
    %c0_29 = arith.constant 0 : index
    %93 = vector.load %arg11[%c0_28, %c0_29] : memref<36x1024xbf16, #tpu.memory_space<vmem>>, vector<4x1024xbf16>
    tpu.vector_store %arg11[%c0_28, %c0_29], %92 {strides = array<i32>} : memref<36x1024xbf16, #tpu.memory_space<vmem>>, vector<4x1024xbf16>,
    %c32_i32 = arith.constant 32 : i32
    %94 = tpu.dynamic_rotate %84 by %c32_i32 dim 1 : vector<4x1024xf32>, i32 -> vector<4x1024xf32>
    %95 = vector.extract_strided_slice %85 {offsets = [1, 0], sizes = [1, 1024], strides = [1, 1]} : vector<9x1024xf32> to vector<1x1024xf32>
    %96 = vector.shape_cast %95 : vector<1x1024xf32> to vector<1024xf32>
    %97 = vector.shape_cast %96 : vector<1024xf32> to vector<1x1024xf32>
    %98 = vector.broadcast %97 : vector<1x1024xf32> to vector<4x1024xf32>
    %99 = arith.mulf %94, %98 : vector<4x1024xf32>
    %100 = arith.truncf %99 : vector<4x1024xf32> to vector<4x1024xbf16>
    %c4 = arith.constant 4 : index
    %c0_30 = arith.constant 0 : index
    %101 = vector.load %arg11[%c4, %c0_30] : memref<36x1024xbf16, #tpu.memory_space<vmem>>, vector<4x1024xbf16>
    tpu.vector_store %arg11[%c4, %c0_30], %100 {strides = array<i32>} : memref<36x1024xbf16, #tpu.memory_space<vmem>>, vector<4x1024xbf16>,
    %c31_i32 = arith.constant 31 : i32
    %102 = tpu.dynamic_rotate %84 by %c31_i32 dim 1 : vector<4x1024xf32>, i32 -> vector<4x1024xf32>
    %103 = vector.extract_strided_slice %85 {offsets = [2, 0], sizes = [1, 1024], strides = [1, 1]} : vector<9x1024xf32> to vector<1x1024xf32>
    %104 = vector.shape_cast %103 : vector<1x1024xf32> to vector<1024xf32>
    %105 = vector.shape_cast %104 : vector<1024xf32> to vector<1x1024xf32>
    %106 = vector.broadcast %105 : vector<1x1024xf32> to vector<4x1024xf32>
    %107 = arith.mulf %102, %106 : vector<4x1024xf32>
    %108 = arith.truncf %107 : vector<4x1024xf32> to vector<4x1024xbf16>
    %c8_31 = arith.constant 8 : index
    %c0_32 = arith.constant 0 : index
    %109 = vector.load %arg11[%c8_31, %c0_32] : memref<36x1024xbf16, #tpu.memory_space<vmem>>, vector<4x1024xbf16>
    tpu.vector_store %arg11[%c8_31, %c0_32], %108 {strides = array<i32>} : memref<36x1024xbf16, #tpu.memory_space<vmem>>, vector<4x1024xbf16>,
    %c1_i32_33 = arith.constant 1 : i32
    %110 = tpu.dynamic_rotate %84 by %c1_i32_33 dim 1 : vector<4x1024xf32>, i32 -> vector<4x1024xf32>
    %111 = vector.extract_strided_slice %85 {offsets = [3, 0], sizes = [1, 1024], strides = [1, 1]} : vector<9x1024xf32> to vector<1x1024xf32>
    %112 = vector.shape_cast %111 : vector<1x1024xf32> to vector<1024xf32>
    %113 = vector.shape_cast %112 : vector<1024xf32> to vector<1x1024xf32>
    %114 = vector.broadcast %113 : vector<1x1024xf32> to vector<4x1024xf32>
    %115 = arith.mulf %110, %114 : vector<4x1024xf32>
    %116 = arith.truncf %115 : vector<4x1024xf32> to vector<4x1024xbf16>
    %c12 = arith.constant 12 : index
    %c0_34 = arith.constant 0 : index
    %117 = vector.load %arg11[%c12, %c0_34] : memref<36x1024xbf16, #tpu.memory_space<vmem>>, vector<4x1024xbf16>
    tpu.vector_store %arg11[%c12, %c0_34], %116 {strides = array<i32>} : memref<36x1024xbf16, #tpu.memory_space<vmem>>, vector<4x1024xbf16>,
    %118 = arith.truncf %84 : vector<4x1024xf32> to vector<4x1024xbf16>
    %c16_35 = arith.constant 16 : index
    %c0_36 = arith.constant 0 : index
    %119 = vector.load %arg11[%c16_35, %c0_36] : memref<36x1024xbf16, #tpu.memory_space<vmem>>, vector<4x1024xbf16>
    tpu.vector_store %arg11[%c16_35, %c0_36], %118 {strides = array<i32>} : memref<36x1024xbf16, #tpu.memory_space<vmem>>, vector<4x1024xbf16>,
    %c1023_i32 = arith.constant 1023 : i32
    %120 = tpu.dynamic_rotate %84 by %c1023_i32 dim 1 : vector<4x1024xf32>, i32 -> vector<4x1024xf32>
    %121 = vector.extract_strided_slice %85 {offsets = [5, 0], sizes = [1, 1024], strides = [1, 1]} : vector<9x1024xf32> to vector<1x1024xf32>
    %122 = vector.shape_cast %121 : vector<1x1024xf32> to vector<1024xf32>
    %123 = vector.shape_cast %122 : vector<1024xf32> to vector<1x1024xf32>
    %124 = vector.broadcast %123 : vector<1x1024xf32> to vector<4x1024xf32>
    %125 = arith.mulf %120, %124 : vector<4x1024xf32>
    %126 = arith.truncf %125 : vector<4x1024xf32> to vector<4x1024xbf16>
    %c20 = arith.constant 20 : index
    %c0_37 = arith.constant 0 : index
    %127 = vector.load %arg11[%c20, %c0_37] : memref<36x1024xbf16, #tpu.memory_space<vmem>>, vector<4x1024xbf16>
    tpu.vector_store %arg11[%c20, %c0_37], %126 {strides = array<i32>} : memref<36x1024xbf16, #tpu.memory_space<vmem>>, vector<4x1024xbf16>,
    %c993_i32 = arith.constant 993 : i32
    %128 = tpu.dynamic_rotate %84 by %c993_i32 dim 1 : vector<4x1024xf32>, i32 -> vector<4x1024xf32>
    %129 = vector.extract_strided_slice %85 {offsets = [6, 0], sizes = [1, 1024], strides = [1, 1]} : vector<9x1024xf32> to vector<1x1024xf32>
    %130 = vector.shape_cast %129 : vector<1x1024xf32> to vector<1024xf32>
    %131 = vector.shape_cast %130 : vector<1024xf32> to vector<1x1024xf32>
    %132 = vector.broadcast %131 : vector<1x1024xf32> to vector<4x1024xf32>
    %133 = arith.mulf %128, %132 : vector<4x1024xf32>
    %134 = arith.truncf %133 : vector<4x1024xf32> to vector<4x1024xbf16>
    %c24_38 = arith.constant 24 : index
    %c0_39 = arith.constant 0 : index
    %135 = vector.load %arg11[%c24_38, %c0_39] : memref<36x1024xbf16, #tpu.memory_space<vmem>>, vector<4x1024xbf16>
    tpu.vector_store %arg11[%c24_38, %c0_39], %134 {strides = array<i32>} : memref<36x1024xbf16, #tpu.memory_space<vmem>>, vector<4x1024xbf16>,
    %c992_i32 = arith.constant 992 : i32
    %136 = tpu.dynamic_rotate %84 by %c992_i32 dim 1 : vector<4x1024xf32>, i32 -> vector<4x1024xf32>
    %137 = vector.extract_strided_slice %85 {offsets = [7, 0], sizes = [1, 1024], strides = [1, 1]} : vector<9x1024xf32> to vector<1x1024xf32>
    %138 = vector.shape_cast %137 : vector<1x1024xf32> to vector<1024xf32>
    %139 = vector.shape_cast %138 : vector<1024xf32> to vector<1x1024xf32>
    %140 = vector.broadcast %139 : vector<1x1024xf32> to vector<4x1024xf32>
    %141 = arith.mulf %136, %140 : vector<4x1024xf32>
    %142 = arith.truncf %141 : vector<4x1024xf32> to vector<4x1024xbf16>
    %c28 = arith.constant 28 : index
    %c0_40 = arith.constant 0 : index
    %143 = vector.load %arg11[%c28, %c0_40] : memref<36x1024xbf16, #tpu.memory_space<vmem>>, vector<4x1024xbf16>
    tpu.vector_store %arg11[%c28, %c0_40], %142 {strides = array<i32>} : memref<36x1024xbf16, #tpu.memory_space<vmem>>, vector<4x1024xbf16>,
    %c991_i32 = arith.constant 991 : i32
    %144 = tpu.dynamic_rotate %84 by %c991_i32 dim 1 : vector<4x1024xf32>, i32 -> vector<4x1024xf32>
    %145 = vector.extract_strided_slice %85 {offsets = [8, 0], sizes = [1, 1024], strides = [1, 1]} : vector<9x1024xf32> to vector<1x1024xf32>
    %146 = vector.shape_cast %145 : vector<1x1024xf32> to vector<1024xf32>
    %147 = vector.shape_cast %146 : vector<1024xf32> to vector<1x1024xf32>
    %148 = vector.broadcast %147 : vector<1x1024xf32> to vector<4x1024xf32>
    %149 = arith.mulf %144, %148 : vector<4x1024xf32>
    %150 = arith.truncf %149 : vector<4x1024xf32> to vector<4x1024xbf16>
    %c32_41 = arith.constant 32 : index
    %c0_42 = arith.constant 0 : index
    %151 = vector.load %arg11[%c32_41, %c0_42] : memref<36x1024xbf16, #tpu.memory_space<vmem>>, vector<4x1024xbf16>
    tpu.vector_store %arg11[%c32_41, %c0_42], %150 {strides = array<i32>} : memref<36x1024xbf16, #tpu.memory_space<vmem>>, vector<4x1024xbf16>,
    %c0_43 = arith.constant 0 : index
    %c0_44 = arith.constant 0 : index
    %152 = vector.load %arg6[%c0_43, %c0_44] : memref<1x36xbf16, #tpu.memory_space<vmem>>, vector<1x36xbf16>
    %c0_45 = arith.constant 0 : index
    %c0_46 = arith.constant 0 : index
    %153 = vector.load %arg11[%c0_45, %c0_46] : memref<36x1024xbf16, #tpu.memory_space<vmem>>, vector<36x1024xbf16>
    %cst_47 = arith.constant dense<0.000000e+00> : vector<1x1024xf32>
    %154 = tpu.matmul %152, %153, %cst_47 {dimension_numbers = #tpu.dot_dimension_numbers<[1], [0], [0], [1], [0, 0, 1, 1], [], []>} : vector<1x36xbf16>, vector<36x1024xbf16>, vector<1x1024xf32> -> vector<1x1024xf32>
    %c0_48 = arith.constant 0 : index
    %c0_49 = arith.constant 0 : index
    %155 = vector.load %arg7[%c0_48, %c0_49] : memref<1x1xf32, #tpu.memory_space<vmem>>, vector<1x1xf32>
    %156 = vector.broadcast %155 : vector<1x1xf32> to vector<1x1024xf32>
    %157 = arith.addf %154, %156 : vector<1x1024xf32>
    %cst_50 = arith.constant 0.000000e+00 : f32
    %158 = vector.broadcast %cst_50 : f32 to vector<1x1024xf32>
    %159 = arith.subf %158, %157 : vector<1x1024xf32>
    %160 = math.exp %159 : vector<1x1024xf32>
    %cst_51 = arith.constant 1.000000e+00 : f32
    %161 = vector.broadcast %cst_51 : f32 to vector<1x1024xf32>
    %162 = arith.addf %161, %160 : vector<1x1024xf32>
    %cst_52 = arith.constant 1.000000e+00 : f32
    %163 = vector.broadcast %cst_52 : f32 to vector<1x1024xf32>
    %164 = arith.divf %163, %162 : vector<1x1024xf32>
    %165 = vector.shape_cast %164 : vector<1x1024xf32> to vector<1x1x1024xf32>
    %c0_53 = arith.constant 0 : index
    %c0_54 = arith.constant 0 : index
    %c0_55 = arith.constant 0 : index
    %166 = vector.load %arg9[%c0_53, %c0_54, %c0_55] : memref<1x1x1024xf32, #tpu.memory_space<vmem>>, vector<1x1x1024xf32>
    tpu.vector_store %arg9[%c0_53, %c0_54, %c0_55], %165 {strides = array<i32>} : memref<1x1x1024xf32, #tpu.memory_space<vmem>>, vector<1x1x1024xf32>,
    return
  }
  func.func @transform_0(%arg0: i32) -> (i32, i32, i32) {
    %c0_i32 = arith.constant 0 : i32
    %c0_i32_0 = arith.constant 0 : i32
    %c0_i32_1 = arith.constant 0 : i32
    return %arg0, %c0_i32, %c0_i32_0 : i32, i32, i32
  }
  func.func @transform_1(%arg0: i32) -> (i32, i32) {
    %c0_i32 = arith.constant 0 : i32
    %c0_i32_0 = arith.constant 0 : i32
    %c0_i32_1 = arith.constant 0 : i32
    return %c0_i32, %c0_i32_0 : i32, i32
  }
  func.func @transform_2(%arg0: i32) -> (i32, i32) {
    %c0_i32 = arith.constant 0 : i32
    %c0_i32_0 = arith.constant 0 : i32
    %c0_i32_1 = arith.constant 0 : i32
    return %c0_i32, %c0_i32_0 : i32, i32
  }
  func.func @transform_3(%arg0: i32) -> (i32, i32) {
    %c0_i32 = arith.constant 0 : i32
    %c0_i32_0 = arith.constant 0 : i32
    %c0_i32_1 = arith.constant 0 : i32
    return %c0_i32, %c0_i32_0 : i32, i32
  }
  func.func @transform_4(%arg0: i32) -> (i32, i32) {
    %c0_i32 = arith.constant 0 : i32
    %c0_i32_0 = arith.constant 0 : i32
    %c0_i32_1 = arith.constant 0 : i32
    return %c0_i32, %c0_i32_0 : i32, i32
  }
  func.func @transform_5(%arg0: i32) -> (i32, i32) {
    %c0_i32 = arith.constant 0 : i32
    %c0_i32_0 = arith.constant 0 : i32
    %c0_i32_1 = arith.constant 0 : i32
    return %c0_i32, %c0_i32_0 : i32, i32
  }
  func.func @transform_6(%arg0: i32) -> (i32, i32) {
    %c0_i32 = arith.constant 0 : i32
    %c0_i32_0 = arith.constant 0 : i32
    %c0_i32_1 = arith.constant 0 : i32
    return %c0_i32, %c0_i32_0 : i32, i32
  }
  func.func @transform_7(%arg0: i32) -> (i32, i32) {
    %c0_i32 = arith.constant 0 : i32
    %c0_i32_0 = arith.constant 0 : i32
    %c0_i32_1 = arith.constant 0 : i32
    return %c0_i32, %c0_i32_0 : i32, i32
  }
  func.func @transform_8(%arg0: i32) -> (i32, i32, i32) {
    %c0_i32 = arith.constant 0 : i32
    %c0_i32_0 = arith.constant 0 : i32
    %c0_i32_1 = arith.constant 0 : i32
    return %arg0, %c0_i32, %c0_i32_0 : i32, i32, i32
  }
}

</mosaic_0001>

<bundles_post_ra>
// kernel: tpu_custom_call.1
= control target key start
LH: loop header
LB: loop body
LE: loop exit
PB: predicated region body
PF: predicated region fallthrough
CT: control target
= control target key end

     0   :  { %s4148_s0 = inlined_call_operand.hbm [shape: f32[2,8,256], index: 0, kind: input, shape index: {}]   ;;  %s4149_s1 = inlined_call_operand.vmem [shape: bf16[4,72], index: 1, kind: input, shape index: {}]   ;;  %s4150_s2 = inlined_call_operand.vmem [shape: f32[4,1], index: 2, kind: input, shape index: {}]   ;;  %s4151_s3 = inlined_call_operand.hbm [shape: f32[9,256], index: 3, kind: input, shape index: {}]   ;;  %s4152_s4 = inlined_call_operand.hbm [shape: f32[256,1024], index: 4, kind: input, shape index: {}]   ;;  %s4153_s5 = inlined_call_operand.vmem [shape: bf16[1,36], index: 5, kind: input, shape index: {}]   ;;  %s4154_s6 = inlined_call_operand.<no memory space> [shape: f32[1,1], index: 6, kind: input, shape index: {}]   ;;  %s4155_s7 = inlined_call_operand.hbm [shape: f32[9,1024], index: 7, kind: input, shape index: {}]   ;;  %s4156_s8 = inlined_call_operand.hbm [shape: f32[2,1,1024], index: 8, kind: output, shape index: {}]  }
   0x1   :  { %4163 = sst [smem:[#allocation18_spill]] %s4151_s3  ;;  %v13_v0 = vstv %s4154_s6 }
   0x2   :  { %4164 = sst [smem:[#allocation19_spill]] %s4152_s4  ;;  %14 = vst [vmem:[#allocation4] sm:$0x1] %v13_v0 }
   0x3   :  { %15 = vsyncpa [#allocation6], 0 }
   0x4   :  { %17 = vsyncpa [#allocation6 + $0x1], 0 }
   0x5   :  { %18 = vsyncpa [#allocation9], 0 }
   0x6   :  { %19 = vsyncpa [#allocation12], 0 }
   0x7   :  { %20 = vsyncpa [#allocation7], 0 }
   0x8   :  { %22 = vsyncpa [#allocation7 + $0x1], 0  ;;  %s3272_s29 = smov 0   ;;  %s3274_s30 = smov 0  }
   0x9   :  { %s3276_s9 = smov 0   ;;  %s3278_s10 = smov 0  }
   0xa LB: > { %s3293_s6 = sadd.s32 4294967295, %s3197_s10   ;;  %s2678_s11 = sadd.s32 4294967294, %s3197_s10   ;;  %s3197_s10 = sphi %s3278_s10, %s4196_s10   ;;  %s3193_s9 = sphi %s3276_s9, %s4195_s9   ;;  %s3189_s30 = sphi %s3274_s30, %s4194_s30   ;;  %s3185_s29 = sphi %s3272_s29, %s4193_s29  }
   0xb   : > { %p48_p0 = scmp.ne.s32.totalorder %s3189_s30, %s3185_s29  ;;  %p4157_p1 = scmp.eq.s32.totalorder %s3293_s6, 0 }
   0xc   : > { %p225_p3 = scmp.eq.s32.totalorder %s2678_s11, 1  ;;  %p2679_p5 = scmp.ge.s32.totalorder %s3197_s10, 1 }
   0xd   : > { %p3302_p4 = por %p4157_p1, %p48_p0  ;;  %p232_p7 = scmp.lt.s32.totalorder %s3197_s10, 3 }
   0xe   : > { %p3307_p6 = por %p225_p3, %p48_p0  ;;  %s3199_s15 = smov [#allocation8]  }
   0xf   : > { %s4165_s12 = scalar_select %p3302_p4, 1, 0 }
  0x10   : > { %s4166_s13 = scalar_select %p3307_p6, 1, 0 }
  0x11   : > { %p3312_p8 = pnand %p2679_p5, %p232_p7  ;;  %s250_s16 = sshll.u32 %s3199_s15, 4  ;;  %s251_s16 = int_to_ptr.vmem [resolvable:$true] %s250_s16 }
  0x12   : > { %s3200_s18 = smov [#allocation10]   ;;  %s3030_s20 = scalar_lea.vmem %s251_s16, 512 }
  0x13   : > { %s4167_s14 = scalar_select %p3312_p8, 1, 0 }
  0x14   : > { %p2872_p9 = pneg %p3312_p8  ;;  %s263_s19 = sshll.u32 %s3200_s18, 4  ;;  %s264_s19 = int_to_ptr.vmem [resolvable:$true] %s263_s19 }
  0x15   : > { %p3031_p13 = scmp.ne.s32.totalorder %s251_s16, %s3030_s20  ;;  %p3038_p5 = scmp.lt.s32.totalorder %s251_s16, %s251_s16 }
  0x16   : > { %p3321_p11 = pnand %p2872_p9, %p4157_p1  ;;  %p3039_p7 = scmp.lt.s32.totalorder %s3030_s20, %s3030_s20 }
  0x18   : > { %p3021_p12 = pneg %p3321_p11  ;;  %p3040_p10 = por %p3039_p7, %p3038_p5 }
  0x1a   : > { %p3033_p0 = pnand %p3031_p13, %p3021_p12 }
  0x1c   : > { %p3034_p3 = pneg %p3033_p0 }
  0x1e   : > { %p3041_p9 = pnand %p3040_p10, %p3034_p3 }
  0x20   : > { %3044 = shalt.err (!%p3041_p9)
}
  0x21   : > { %s3201_s21 = smov 256   ;;  %s3202_s22 = smov 16  }
  0x22   : > { %s4169_s3 = sld [smem:[#allocation18_spill]]  ;;  %s3056_s25 = scalar_lea.vmem %s264_s19, 32768 }
  0x23   : > { %p3057_p1 = scmp.ne.s32.totalorder %s264_s19, %s3056_s25  ;;  %p3064_p2 = scmp.lt.s32.totalorder %s264_s19, %s264_s19 }
  0x24   : > { %p3065_p6 = scmp.lt.s32.totalorder %s3056_s25, %s3056_s25 }
  0x25   : > { %p3059_p13 = pnand %p3057_p1, %p3021_p12 }
  0x26   : > { %p3066_p5 = por %p3065_p6, %p3064_p2 }
  0x27   : > { %p3060_p0 = pneg %p3059_p13 }
  0x28   : > { %2875 = dma.hbm_to_vmem [thread:$0]  (!%p3321_p11), %s4169_s3, 512, %s251_s16, [#allocation9], %s3201_s21, %s3201_s21, %s3202_s22  }
  0x29   : > { %p3067_p10 = pnand %p3066_p5, %p3060_p0 }
  0x2b   : > { %3070 = shalt.err (!%p3067_p10)
}
  0x2c   : > { %s3203_s26 = smov 1024   ;;  %s3204_s27 = smov 64  }
  0x2d   : > { %s4170_s4 = sld [smem:[#allocation19_spill]]  ;;  %s3205_s15 = smov [#allocation11]  }
  0x2e   : > { %s282_s16 = sshll.u32 %s3205_s15, 4  ;;  %s3344_s18 = sadd.s32 1, %s3197_s10   ;;  %s283_s16 = int_to_ptr.vmem [resolvable:$true] %s282_s16 }
  0x2f   : > { %s3082_s20 = scalar_lea.vmem %s283_s16, 2048  ;;  %p3090_p3 = scmp.lt.s32.totalorder %s283_s16, %s283_s16 }
  0x30   : > { %p3083_p1 = scmp.ne.s32.totalorder %s283_s16, %s3082_s20  ;;  %p3091_p7 = scmp.lt.s32.totalorder %s3082_s20, %s3082_s20 }
  0x32   : > { %p3085_p2 = pnand %p3083_p1, %p3021_p12  ;;  %p3092_p9 = por %p3091_p7, %p3090_p3 }
  0x33   : > { %2878 = dma.hbm_to_vmem [thread:$0]  (!%p3321_p11), %s4170_s4, 32768, %s264_s19, [#allocation9], %s3203_s26, %s3203_s26, %s3204_s27  }
  0x34   : > { %p3086_p6 = pneg %p3085_p2 }
  0x36   : > { %p3093_p13 = pnand %p3092_p9, %p3086_p6 }
  0x38   : > { %3096 = shalt.err (!%p3093_p13)
}
  0x39   : > { %2881 = dma.hbm_to_vmem [thread:$0]  (!%p3321_p11), %s4155_s7, 2048, %s283_s16, [#allocation12], %s3203_s26, %s3203_s26, %s3204_s27  }
  0x3a   : > { %s32_s22 = ssub.s32 %s3197_s10, %s3344_s18  ;;  %s35_s23 = sadd.s32 1, %s3193_s9 }
  0x3b   : > { %p33_p12 = scmp.eq.s32.totalorder %s32_s22, 0  ;;  %p42_p0 = scmp.ne.s32.totalorder %s3193_s9, %s3189_s30 }
  0x3c   : > { %p43_p5 = scmp.eq.s32.totalorder %s3197_s10, 0  ;;  %p2893_p10 = scmp.lt.s32.totalorder %s3197_s10, 2 }
  0x3d   : > { %s3362_s17 = scalar_select %p33_p12, %s3193_s9, %s35_s23  }
  0x3e   : > { %p44_p1 = por %p43_p5, %p42_p0  ;;  %p4171_p2 = scmp.eq.s32.totalorder %s3293_s6, 1 }
  0x3f   : > { %s296_s25 = sand.u32 1, %s3193_s9   ;;  %s2799_s28 = sshll.u32 %s3197_s10, 8 }
  0x40   : > { %p3366_p6 = por %p4171_p2, %p42_p0  ;;  %s2684_s11 = sshll.u32 %s296_s25, 4 }
  0x41   : > { %s3375_s26 = scalar_lea.hbm %s4148_s0, %s2799_s28  ;;  %s300_s27 = scalar_lea.vmem [#allocation5], %s2684_s11 }
  0x42   : > { %s4172_s24 = scalar_select %p3366_p6, 1, 0 }
  0x43   : > { %s308_s16 = sshll.u32 %s300_s27, 4  ;;  %p3377_p11 = pnand %p2893_p10, %p44_p1  ;;  %s309_s16 = int_to_ptr.vmem [resolvable:$true] %s308_s16 }
  0x44   : > { %s297_s19 = scalar_lea.sflag [#allocation6], %s296_s25  ;;  %s3097_s22 = scalar_lea.hbm %s3375_s26, 256 }
  0x45   : > { %p3098_p3 = scmp.ne.s32.totalorder %s3375_s26, %s3097_s22  ;;  %p3099_p7 = pneg %p3377_p11 }
  0x46   : > { %s3102_s15 = scalar_lea.hbm %s4148_s0, 512  ;;  %p3103_p12 = scmp.lt.s32.totalorder %s3375_s26, %s4148_s0 }
  0x47   : > { %p3100_p9 = pnand %p3099_p7, %p3098_p3  ;;  %p3104_p0 = scmp.lt.s32.totalorder %s3102_s15, %s3097_s22 }
  0x49   : > { %p3101_p13 = pneg %p3100_p9  ;;  %p3105_p5 = por %p3104_p0, %p3103_p12 }
  0x4b   : > { %p3106_p10 = pnand %p3105_p5, %p3101_p13 }
  0x4d   : > { %3109 = shalt.err (!%p3106_p10)
}
  0x4e   : > { %s3110_s27 = scalar_lea.vmem %s309_s16, 256  ;;  %s3206_s25 = smov [#allocation5]  }
  0x4f   : > { %p3111_p1 = scmp.ne.s32.totalorder %s309_s16, %s3110_s27  ;;  %s3115_s3 = sshll.u32 %s3206_s25, 4  ;;  %s3116_s3 = int_to_ptr.vmem [resolvable:$false] %s3115_s3 }
  0x50   : > { %s3117_s4 = scalar_lea.vmem %s3116_s3, 512  ;;  %p3118_p3 = scmp.lt.s32.totalorder %s309_s16, %s3116_s3 }
  0x51   : > { %p3113_p2 = pnand %p3111_p1, %p3099_p7  ;;  %p3119_p9 = scmp.lt.s32.totalorder %s3117_s4, %s3110_s27 }
  0x53   : > { %p3114_p6 = pneg %p3113_p2  ;;  %p3120_p4 = por %p3119_p9, %p3118_p3 }
  0x55   : > { %p3121_p8 = pnand %p3120_p4, %p3114_p6 }
  0x57   : > { %3124 = shalt.err (!%p3121_p8)
}
  0x58   : > { %2885 = dma.hbm_to_vmem [thread:$0]  (!%p3377_p11), %s3375_s26, 256, %s309_s16, %s297_s19  }
  0x59   : > { %p4174_p13 = scmp.ne.s32.totalorder %s4167_s14, 0 }
  0x5a   : > { %s3398_s22 = sand.u32 (!%p4174_p13), 1, %s3189_s30   ;;  %p4175_p7 = scmp.ne.s32.totalorder (!%p4174_p13), %s4165_s12, 0 }
  0x5b   : > { %317 = sbr.rel (%p4174_p13) target bundleno = 1187 (0x4a3), region = 52  ;;  %s2688_s23 = sshll.u32 (!%p4174_p13), %s3398_s22, 4 }
  0x5c   : > { %s320_s28 = scalar_lea.sflag (!%p4174_p13), [#allocation6], %s3398_s22  ;;  %s323_s3 = scalar_lea.vmem (!%p4174_p13), [#allocation5], %s2688_s23 }
  0x60   : > { %3168 = dma.done.wait (%p4175_p7), %s320_s28, 256  }
  0x61   : > { %3170 = vsyncadd (%p4175_p7), %s320_s28, 4294967040  ;;  %p4176_p4 = scmp.eq.s32.totalorder %s3293_s6, 0 }
  0x63   : > { %3172 = dma.done.wait (%p4176_p4), [#allocation9], 33280   ;;  %p4177_p8 = pmov %p4176_p4 }
  0x64   : > { %p4178_p6 = pmov %p4176_p4 }
  0x65   : > { %3174 = vsyncadd (%p4177_p8), [#allocation9], 4294934016 }
  0x66   : > { %3176 = dma.done.wait (%p4178_p6), [#allocation12], 2048   ;;  %p4179_p11 = pmov %p4176_p4 }
  0x67   : > { %v3414_v1 = vld [vmem:[%s323_s3] sm:$0xff]  ;;  %s3207_s4 = smov 113   ;;  %s3208_s14 = smov 111   ;;  %v3418_v2 = vld [vmem:[%s323_s3 + $0x8] sm:$0xff]  ;;  %v4161_v3 = vmov 0   ;;  %v379_v43 = vlaneseq  ;;  %vm659_vm3 = vcmask 1043456  }
  0x68   : > { %3178 = vsyncadd (%p4179_p11), [#allocation12], 4294965248  ;;  %516 = vrot.lane.b32.xlu1 %v3414_v1, %s3207_s4  ;;  %568 = vrot.lane.b32.xlu0 %v3414_v1, %s3208_s14  ;;  %s3209_s12 = smov 112   ;;  %s3210_s26 = smov 127   ;;  %v840_v4 = vld [vmem:[#allocation10 + $0x3c8] sm:$0xff]  ;;  %v839_v5 = vld [vmem:[#allocation10 + $0x3c0] sm:$0xff] }
  0x69   : > { %s3211_s16 = smov 15   ;;  %s3212_s21 = smov 1   ;;  %698 = vmatprep.mubr.bf16.mxu0 %v4161_v3  ;;  %2953 = vset.pattern.permute.xlu0 %v4161_v3  ;;  %v832_v6 = vld [vmem:[#allocation10 + $0x388] sm:$0xff]  ;;  %v831_v7 = vld [vmem:[#allocation10 + $0x380] sm:$0xff]  ;;  %v3443_v44 = vshrl.u32 %v379_v43, 7  ;;  %v3445_v45 = vand.u32 127, %v379_v43 }
  0x6a   : > { %s3214_s19 = smov 17   ;;  %975 = vmatprep.subr.mxu1 %v840_v4  ;;  %v824_v8 = vld [vmem:[#allocation10 + $0x348] sm:$0xff]  ;;  %s3215_s15 = smov 16   ;;  %v823_v9 = vld [vmem:[#allocation10 + $0x340] sm:$0xff]  ;;  %v2701_v52 = vld [vmem:[#allocation8 + $0x10] ss:$0 sm:$0xff] }
  0x6b   : > { %976 = vmatpush1.msra.mxu1 %v839_v5  ;;  %v604_v10 = vld [vmem:[%s4150_s2] sm:$0xf]  ;;  %v816_v11 = vld [vmem:[#allocation10 + $0x308] sm:$0xff]  ;;  %v3448_v48 = vsub.s32 6, %v3443_v44  ;;  %v3453_v50 = vsub.s32 7, %v3443_v44  ;;  %vm572_vm0 = vcmp.lt.s32.totalorder %v3445_v45, 111 }
  0x6c   : > { %518 = vrot.lane.b32.xlu1 %v3418_v2, %s3207_s4  ;;  %570 = vrot.lane.b32.xlu0 %v3418_v2, %s3208_s14  ;;  %v815_v12 = vld [vmem:[#allocation10 + $0x300] sm:$0xff]  ;;  %v808_v13 = vld [vmem:[#allocation10 + $0x2c8] sm:$0xff]  ;;  %vm520_vm1 = vcmp.lt.s32.totalorder %v3445_v45, 113  ;;  %v2702_v53 = vld [vmem:[#allocation8 + $0x18] ss:$0 sm:$0xff]  ;;  %vm546_vm2 = vcmp.lt.s32.totalorder %v3445_v45, 112 }
  0x6d   : > { %977 = vmatprep.subr.mxu1 %v832_v6  ;;  %v807_v14 = vld [vmem:[#allocation10 + $0x2c0] sm:$0xff]  ;;  %v800_v15 = vld [vmem:[#allocation10 + $0x288] sm:$0xff]  ;;  %v3463_v57 = vsub.s32 5, %v3443_v44  ;;  %vm494_vm4 = vcmp.lt.s32.totalorder %v3445_v45, 127  ;;  %vm433_vm5 = vcmp.lt.s32.totalorder %v3445_v45, 15  ;;  %vm459_vm6 = vcmp.lt.s32.totalorder %v3445_v45, 1 }
  0x6e   : > { %978 = vmatpush1.msra.mxu1 %v831_v7  ;;  %v799_v16 = vld [vmem:[#allocation10 + $0x280] sm:$0xff]  ;;  %v792_v17 = vld [vmem:[#allocation10 + $0x248] sm:$0xff]  ;;  %vm381_vm7 = vcmp.lt.s32.totalorder %v3445_v45, 17  ;;  %vm407_vm8 = vcmp.lt.s32.totalorder %v3445_v45, 16  ;;  %vm655_vm9 = vcmask 588800   ;;  %s3216_s23 = smov 95  }
  0x6f   : > { %979 = vmatprep.subr.mxu1 %v824_v8  ;;  %v791_v18 = vld [vmem:[#allocation10 + $0x240] sm:$0xff]  ;;  %v784_v19 = vld [vmem:[#allocation10 + $0x208] sm:$0xff]  ;;  %s3217_s28 = smov 96   ;;  %s3218_s3 = smov 32   ;;  %vm2048_vm12 = vcmp.lt.s32.totalorder %v3445_v45, 95  ;;  %vm1943_vm13 = vcmp.lt.s32.totalorder %v3445_v45, 96 }
  0x70   : > { %544 = vrot.lane.b32.xlu1 %v3418_v2, %s3209_s12  ;;  %542 = vrot.lane.b32.xlu0 %v3414_v1, %s3209_s12  ;;  %v783_v20 = vld [vmem:[#allocation10 + $0x200] sm:$0xff]  ;;  %v776_v21 = vld [vmem:[#allocation10 + $0x1c8] sm:$0xff]  ;;  %s3219_s4 = smov 97   ;;  %s3220_s14 = smov 33   ;;  %vm1842_vm14 = vcmp.lt.s32.totalorder %v3445_v45, 97  ;;  %vm1392_vm15 = vcmp.lt.s32.totalorder %v3445_v45, 32 }
  0x71   : > { %980 = vmatpush1.msra.mxu1 %v823_v9  ;;  %v775_v22 = vld [vmem:[#allocation10 + $0x1c0] sm:$0xff]  ;;  %v768_v23 = vld [vmem:[#allocation10 + $0x188] sm:$0xff]  ;;  %s3221_s12 = smov 31   ;;  %p4190_p0 = scmp.ne.s32.totalorder %s4172_s24, 0 }
  0x72   : > { %981 = vmatprep.subr.mxu1 %v816_v11  ;;  %v767_v24 = vld [vmem:[#allocation10 + $0x180] sm:$0xff]  ;;  %v760_v25 = vld [vmem:[#allocation10 + $0x148] sm:$0xff] }
  0x73   : > { %982 = vmatpush1.msra.mxu1 %v815_v12  ;;  %v759_v26 = vld [vmem:[#allocation10 + $0x140] sm:$0xff]  ;;  %v752_v27 = vld [vmem:[#allocation10 + $0x108] sm:$0xff] }
  0x74   : > { %492 = vrot.lane.b32.xlu1 %v3418_v2, %s3210_s26  ;;  %490 = vrot.lane.b32.xlu0 %v3414_v1, %s3210_s26  ;;  %v751_v28 = vld [vmem:[#allocation10 + $0x100] sm:$0xff]  ;;  %v744_v29 = vld [vmem:[#allocation10 + $0xc8] sm:$0xff] }
  0x75   : > { %983 = vmatprep.subr.mxu1 %v808_v13  ;;  %v743_v30 = vld [vmem:[#allocation10 + $0xc0] sm:$0xff]  ;;  %v736_v31 = vld [vmem:[#allocation10 + $0x88] sm:$0xff] }
  0x76   : > { %984 = vmatpush1.msra.mxu1 %v807_v14  ;;  %v735_v32 = vld [vmem:[#allocation10 + $0x80] sm:$0xff]  ;;  %v728_v33 = vld [vmem:[#allocation10 + $0x48] sm:$0xff] }
  0x77   : > { %985 = vmatprep.subr.mxu1 %v800_v15  ;;  %v727_v34 = vld [vmem:[#allocation10 + $0x40] sm:$0xff]  ;;  %v720_v35 = vld [vmem:[#allocation10 + $0x8] sm:$0xff] }
  0x78   : > { %431 = vrot.lane.b32.xlu1 %v3418_v2, %s3211_s16  ;;  %429 = vrot.lane.b32.xlu0 %v3414_v1, %s3211_s16  ;;  %v719_v36 = vld [vmem:[#allocation10] sm:$0xff]  ;;  %v968_v37 = vld [vmem:[#allocation10 + $0x7c8] sm:$0xff] }
  0x79   : > { %986 = vmatpush1.msra.mxu1 %v799_v16  ;;  %v967_v38 = vld [vmem:[#allocation10 + $0x7c0] sm:$0xff]  ;;  %v960_v39 = vld [vmem:[#allocation10 + $0x788] sm:$0xff] }
  0x7a   : > { %987 = vmatprep.subr.mxu1 %v792_v17  ;;  %v959_v40 = vld [vmem:[#allocation10 + $0x780] sm:$0xff]  ;;  %v952_v41 = vld [vmem:[#allocation10 + $0x748] sm:$0xff] }
  0x7b   : > { %988 = vmatpush1.msra.mxu1 %v791_v18  ;;  %v951_v42 = vld [vmem:[#allocation10 + $0x740] sm:$0xff]  ;;  %v3455_v51 = vld [vmem:[#allocation8 + $0x8] sm:$0xff] }
  0x7c   : > { %457 = vrot.lane.b32.xlu1 %v3418_v2, %s3212_s21  ;;  %455 = vrot.lane.b32.xlu0 %v3414_v1, %s3212_s21  ;;  %v3450_v49 = vld [vmem:[#allocation8] sm:$0xff]  ;;  %v530_v58 = vrot.slane %v3455_v51, %v3448_v48  ;;  %v556_v0 = vrot.slane %v3455_v51, %v3453_v50  ;;  %v504_v14 = vrot.slane %v3455_v51, %v3463_v57 }
  0x7d   : > { %989 = vmatprep.subr.mxu1 %v784_v19  ;;  %v526_v54 = vrot.slane %v3450_v49, %v3448_v48  ;;  %v552_v61 = vrot.slane %v3450_v49, %v3453_v50 }
  0x7e   : > { %990 = vmatpush1.msra.mxu1 %v783_v20 }
  0x7f   : > { %991 = vmatprep.subr.mxu1 %v776_v21 }
  0x80   : > { %377 = vrot.lane.b32.xlu1 %v3418_v2, %s3214_s19  ;;  %375 = vrot.lane.b32.xlu0 %v3414_v1, %s3214_s19  ;;  %s2845_s19 = sshll.u32 %s3293_s6, 7 }
  0x81   : > { %992 = vmatpush1.msra.mxu1 %v775_v22  ;;  %s2577_s25 = scalar_lea.hbm %s4156_s8, %s2845_s19 }
  0x82   : > { %993 = vmatprep.subr.mxu1 %v768_v23 }
  0x83   : > { %994 = vmatpush1.msra.mxu1 %v767_v24 }
  0x84   : > { %405 = vrot.lane.b32.xlu1 %v3418_v2, %s3215_s15  ;;  %403 = vrot.lane.b32.xlu0 %v3414_v1, %s3215_s15 }
  0x85   : > { %995 = vmatprep.subr.mxu1 %v760_v25  ;;  %v3489_v25 = vsub.s32 2, %v3443_v44 }
  0x86   : > { %996 = vmatpush1.msra.mxu1 %v759_v26 }
  0x87   : > { %997 = vmatprep.subr.mxu1 %v752_v27 }
  0x88   : > { %607 = vperm.xlu0 %2953, %v604_v10   ;;  %998 = vmatpush1.msra.mxu1 %v751_v28  ;;  %v500_v10 = vrot.slane %v3450_v49, %v3463_v57  ;;  %v3492_v28 = vsub.s32 3, %v3443_v44 }
  0x89   : > { %999 = vmatprep.subr.mxu1 %v744_v29 }
  0x8a   : > { %1000 = vmatpush1.msra.mxu1 %v743_v30 }
  0x8b   : > { %1001 = vmatprep.subr.mxu1 %v736_v31 }
  0x8c   : > { %1002 = vmatpush1.msra.mxu1 %v735_v32 }
  0x8d   : > { %1003 = vmatprep.subr.mxu1 %v728_v33  ;;  %v439_v33 = vrot.slane %v3450_v49, %v3489_v25 }
  0x8e   : > { %1004 = vmatpush1.msra.mxu1 %v727_v34  ;;  %v443_v34 = vrot.slane %v3455_v51, %v3489_v25 }
  0x8f   : > { %1005 = vmatprep.subr.mxu1 %v720_v35  ;;  %v465_v35 = vrot.slane %v3450_v49, %v3492_v28 }
  0x90   : > { %1006 = vmatpush1.msra.mxu1 %v719_v36  ;;  %v469_v36 = vrot.slane %v3455_v51, %v3492_v28 }
  0x91   : > { %1007 = vmatprep.subr.mxu1 %v968_v37 }
  0x92   : > { %1008 = vmatpush2.msra.mxu1 %v967_v38 }
  0x93   : > { %1009 = vmatprep.subr.mxu1 %v960_v39 }
  0x94   : > { %1010 = vmatpush2.msra.mxu1 %v959_v40 }
  0x95   : > { %1011 = vmatprep.subr.mxu1 %v952_v41  ;;  %v3511_v41 = vsub.s32 0, %v3443_v44 }
  0x96   : > { %1012 = vmatpush2.msra.mxu1 %v951_v42  ;;  %v3514_v42 = vsub.s32 1, %v3443_v44 }
  0xda   : > { %v517_v46 = vpop.permute.xlu1 %516  ;;  %v569_v47 = vpop.permute.xlu0 %568 }
  0xde   : > { %v519_v55 = vpop.permute.xlu1 %518  ;;  %v571_v56 = vpop.permute.xlu0 %570 }
  0xdf   : > { %v573_v59 = vsel %vm572_vm0, %v569_v47, %v571_v56  ;;  %v574_v60 = vsel %vm572_vm0, %v571_v56, %v569_v47  ;;  %v521_v62 = vsel %vm520_vm1, %v517_v46, %v519_v55  ;;  %v522_v5 = vsel %vm520_vm1, %v519_v55, %v517_v46 }
  0xe0   : > { %v583_v63 = vmul.f32 %v2701_v52, %v573_v59  ;;  %v584_v4 = vmul.f32 %v2702_v53, %v574_v60  ;;  %v531_v11 = vmul.f32 %v526_v54, %v521_v62  ;;  %v532_v15 = vmul.f32 %v530_v58, %v522_v5 }
  0xe1   : > { %v387_v58 = vrot.slane %v3450_v49, %v3511_v41  ;;  %v391_v59 = vrot.slane %v3455_v51, %v3511_v41  ;;  %v413_v60 = vrot.slane %v3450_v49, %v3514_v42  ;;  %v594_v49 = vld [vmem:[%s4149_s1] sm:$0x3]  ;;  %vm2268_vm0 = vcmask 1041408  }
  0xe2   : > { %v545_v6 = vpop.permute.xlu1 %544  ;;  %v543_v7 = vpop.permute.xlu0 %542  ;;  %v2855_v8 = vpack.c.bf16 %v584_v4, %v584_v4  ;;  %v2854_v9 = vpack.c.bf16 %v583_v63, %v583_v63  ;;  %vm1291_vm1 = vcmp.lt.s32.totalorder %v3445_v45, 33 }
  0xe3   : > { %v547_v12 = vsel %vm546_vm2, %v543_v7, %v545_v6  ;;  %v548_v13 = vsel %vm546_vm2, %v545_v6, %v543_v7  ;;  %vm1497_vm2 = vcmp.lt.s32.totalorder %v3445_v45, 31 }
  0xe4   : > { %v557_v16 = vmul.f32 %v552_v61, %v547_v12  ;;  %v558_v17 = vmul.f32 %v556_v0, %v548_v13  ;;  %2714 = vmatprep.subr.msk.bf16.mxu0 %vm659_vm3, %v2855_v8  ;;  %v661_v18 = vsel %vm659_vm3, %v2854_v9, 0  ;;  %v417_v61 = vrot.slane %v3455_v51, %v3514_v42  ;;  %v842_v13 = vld [vmem:[#allocation10 + $0x3d8] sm:$0xff]  ;;  %v841_v51 = vld [vmem:[#allocation10 + $0x3d0] sm:$0xff] }
  0xe5   : > { %673 = vmatpush1.bf16.msra.mxu0 %v661_v18  ;;  %v818_v18 = vld [vmem:[#allocation10 + $0x318] sm:$0xff]  ;;  %vm2264_vm3 = vcmask 293888  }
  0xe6   : > { %v493_v19 = vpop.permute.xlu1 %492  ;;  %v491_v20 = vpop.permute.xlu0 %490  ;;  %v2853_v21 = vpack.c.bf16 %v558_v17, %v532_v15  ;;  %v2852_v22 = vpack.c.bf16 %v557_v16, %v531_v11  ;;  %v833_v15 = vld [vmem:[#allocation10 + $0x390] sm:$0xff]  ;;  %v826_v16 = vld [vmem:[#allocation10 + $0x358] sm:$0xff] }
  0xe7   : > { %v495_v23 = vsel %vm494_vm4, %v491_v20, %v493_v19  ;;  %v496_v24 = vsel %vm494_vm4, %v493_v19, %v491_v20  ;;  %v825_v17 = vld [vmem:[#allocation10 + $0x350] sm:$0xff]  ;;  %v810_v20 = vld [vmem:[#allocation10 + $0x2d8] sm:$0xff] }
  0xe8   : > { %v505_v26 = vmul.f32 %v500_v10, %v495_v23  ;;  %v506_v27 = vmul.f32 %v504_v14, %v496_v24  ;;  %674 = vmatprep.subr.bf16.mxu0 %v2853_v21  ;;  %v834_v14 = vld [vmem:[#allocation10 + $0x398] sm:$0xff]  ;;  %v817_v19 = vld [vmem:[#allocation10 + $0x310] sm:$0xff] }
  0xe9   : > { %675 = vmatpush1.bf16.msra.mxu0 %v2852_v22  ;;  %v809_v21 = vld [vmem:[#allocation10 + $0x2d0] sm:$0xff]  ;;  %v802_v22 = vld [vmem:[#allocation10 + $0x298] sm:$0xff] }
  0xea   : > { %v432_v29 = vpop.permute.xlu1 %431  ;;  %v430_v30 = vpop.permute.xlu0 %429  ;;  %v2851_v31 = vpack.c.bf16 %v506_v27, %v3418_v2  ;;  %v2850_v32 = vpack.c.bf16 %v505_v26, %v3414_v1  ;;  %v801_v23 = vld [vmem:[#allocation10 + $0x290] sm:$0xff]  ;;  %v794_v24 = vld [vmem:[#allocation10 + $0x258] sm:$0xff] }
  0xeb   : > { %v434_v37 = vsel %vm433_vm5, %v430_v30, %v432_v29  ;;  %v435_v38 = vsel %vm433_vm5, %v432_v29, %v430_v30  ;;  %v793_v26 = vld [vmem:[#allocation10 + $0x250] sm:$0xff]  ;;  %v786_v27 = vld [vmem:[#allocation10 + $0x218] sm:$0xff] }
  0xec   : > { %676 = vmatprep.subr.bf16.mxu0 %v2851_v31  ;;  %v444_v43 = vmul.f32 %v439_v33, %v435_v38  ;;  %v445_v46 = vmul.f32 %v443_v34, %v434_v37  ;;  %v785_v29 = vld [vmem:[#allocation10 + $0x210] sm:$0xff]  ;;  %v778_v30 = vld [vmem:[#allocation10 + $0x1d8] sm:$0xff] }
  0xed   : > { %677 = vmatpush1.bf16.msra.mxu0 %v2850_v32  ;;  %v777_v31 = vld [vmem:[#allocation10 + $0x1d0] sm:$0xff]  ;;  %v770_v32 = vld [vmem:[#allocation10 + $0x198] sm:$0xff] }
  0xee   : > { %v458_v2 = vpop.permute.xlu1 %457  ;;  %v456_v1 = vpop.permute.xlu0 %455  ;;  %v769_v33 = vld [vmem:[#allocation10 + $0x190] sm:$0xff]  ;;  %v762_v34 = vld [vmem:[#allocation10 + $0x158] sm:$0xff] }
  0xef   : > { %v460_v39 = vsel %vm459_vm6, %v456_v1, %v458_v2  ;;  %v461_v40 = vsel %vm459_vm6, %v458_v2, %v456_v1  ;;  %v753_v37 = vld [vmem:[#allocation10 + $0x110] sm:$0xff]  ;;  %v746_v38 = vld [vmem:[#allocation10 + $0xd8] sm:$0xff] }
  0xf0   : > { %v470_v47 = vmul.f32 %v465_v35, %v461_v40  ;;  %v471_v52 = vmul.f32 %v469_v36, %v460_v39  ;;  %v761_v35 = vld [vmem:[#allocation10 + $0x150] sm:$0xff]  ;;  %v754_v36 = vld [vmem:[#allocation10 + $0x118] sm:$0xff] }
  0xf1   : > { %v745_v2 = vld [vmem:[#allocation10 + $0xd0] sm:$0xff]  ;;  %v738_v1 = vld [vmem:[#allocation10 + $0x98] sm:$0xff] }
  0xf2   : > { %v378_v53 = vpop.permute.xlu1 %377  ;;  %v376_v54 = vpop.permute.xlu0 %375  ;;  %v2849_v55 = vpack.c.bf16 %v471_v52, %v445_v46  ;;  %v2848_v56 = vpack.c.bf16 %v470_v47, %v444_v43  ;;  %v737_v39 = vld [vmem:[#allocation10 + $0x90] sm:$0xff]  ;;  %v730_v40 = vld [vmem:[#allocation10 + $0x58] sm:$0xff] }
  0xf3   : > { %v382_v62 = vsel %vm381_vm7, %v376_v54, %v378_v53  ;;  %v383_v63 = vsel %vm381_vm7, %v378_v53, %v376_v54  ;;  %v729_v43 = vld [vmem:[#allocation10 + $0x50] sm:$0xff]  ;;  %v722_v46 = vld [vmem:[#allocation10 + $0x18] sm:$0xff] }
  0xf4   : > { %678 = vmatprep.subr.bf16.mxu0 %v2849_v55  ;;  %v392_v7 = vmul.f32 %v387_v58, %v383_v63  ;;  %v393_v8 = vmul.f32 %v391_v59, %v382_v62  ;;  %v721_v47 = vld [vmem:[#allocation10 + $0x10] sm:$0xff]  ;;  %v970_v52 = vld [vmem:[#allocation10 + $0x7d8] sm:$0xff]  ;;  %v944_v59 = vld [vmem:[#allocation10 + $0x708] sm:$0xff] }
  0xf5   : > { %679 = vmatpush1.bf16.msra.mxu0 %v2848_v56  ;;  %v969_v53 = vld [vmem:[#allocation10 + $0x7d0] sm:$0xff]  ;;  %v962_v54 = vld [vmem:[#allocation10 + $0x798] sm:$0xff]  ;;  %1013 = vmatprep.subr.mxu1 %v944_v59  ;;  %v936_v63 = vld [vmem:[#allocation10 + $0x6c8] sm:$0xff] }
  0xf6   : > { %v406_v0 = vpop.permute.xlu1 %405  ;;  %v404_v4 = vpop.permute.xlu0 %403  ;;  %v961_v55 = vld [vmem:[#allocation10 + $0x790] sm:$0xff]  ;;  %v954_v56 = vld [vmem:[#allocation10 + $0x758] sm:$0xff] }
  0xf7   : > { %v408_v5 = vsel %vm407_vm8, %v404_v4, %v406_v0  ;;  %v409_v6 = vsel %vm407_vm8, %v406_v0, %v404_v4  ;;  %v953_v58 = vld [vmem:[#allocation10 + $0x750] sm:$0xff]  ;;  %v938_v0 = vld [vmem:[#allocation10 + $0x6d8] sm:$0xff]  ;;  %v935_v4 = vld [vmem:[#allocation10 + $0x6c0] sm:$0xff] }
  0xf8   : > { %v418_v9 = vmul.f32 %v413_v60, %v409_v6  ;;  %v419_v10 = vmul.f32 %v417_v61, %v408_v5  ;;  %v946_v60 = vld [vmem:[#allocation10 + $0x718] sm:$0xff]  ;;  %v943_v61 = vld [vmem:[#allocation10 + $0x700] sm:$0xff]  ;;  %v945_v62 = vld [vmem:[#allocation10 + $0x710] sm:$0xff] }
  0xf9   : > { %1014 = vmatpush2.msra.mxu1 %v943_v61  ;;  %v937_v5 = vld [vmem:[#allocation10 + $0x6d0] sm:$0xff]  ;;  %v928_v6 = vld [vmem:[#allocation10 + $0x688] sm:$0xff] }
  0xfa   : > { %v2847_v11 = vpack.c.bf16 %v419_v10, %v393_v8  ;;  %v2846_v12 = vpack.c.bf16 %v418_v9, %v392_v7  ;;  %1015 = vmatprep.subr.mxu1 %v936_v63  ;;  %v930_v7 = vld [vmem:[#allocation10 + $0x698] sm:$0xff]  ;;  %v927_v8 = vld [vmem:[#allocation10 + $0x680] sm:$0xff]  ;;  %v929_v9 = vld [vmem:[#allocation10 + $0x690] sm:$0xff] }
  0xfb   : > { %1016 = vmatpush2.msra.mxu1 %v935_v4  ;;  %v920_v10 = vld [vmem:[#allocation10 + $0x648] sm:$0xff] }
  0xfc   : > { %680 = vmatprep.subr.bf16.mxu0 %v2847_v11  ;;  %1017 = vmatprep.subr.mxu1 %v928_v6  ;;  %v922_v11 = vld [vmem:[#allocation10 + $0x658] sm:$0xff] }
  0xfd   : > { %681 = vmatpush1.bf16.msra.mxu0 %v2846_v12  ;;  %1018 = vmatpush2.msra.mxu1 %v927_v8  ;;  %v919_v12 = vld [vmem:[#allocation10 + $0x640] sm:$0xff] }
  0xfe   : > { %1046 = vmatprep.subr.mxu0 %v842_v13  ;;  %1019 = vmatprep.subr.mxu1 %v920_v10  ;;  %v921_v13 = vld [vmem:[#allocation10 + $0x650] sm:$0xff] }
  0xff   : > { %1020 = vmatpush2.msra.mxu1 %v919_v12 }
 0x100   : > { %2715 = vmatmul.mubr.msk.bf16.vlgmr.msra.gmra.mxu0 %vm655_vm9, %v594_v49  ;;  %v912_v49 = vld [vmem:[#allocation10 + $0x608] sm:$0xff] }
 0x101   : > { %1047 = vmatpush1.msra.mxu0 %v841_v51  ;;  %v914_v51 = vld [vmem:[#allocation10 + $0x618] sm:$0xff]  ;;  %1021 = vmatprep.subr.mxu1 %v912_v49  ;;  %v843_v49 = vld [vmem:[#allocation10 + $0x3e0] sm:$0xff] }
 0x102   : > { %1048 = vmatprep.subr.mxu0 %v834_v14  ;;  %v911_v14 = vld [vmem:[#allocation10 + $0x600] sm:$0xff] }
 0x103   : > { %1049 = vmatpush1.msra.mxu0 %v833_v15  ;;  %v913_v15 = vld [vmem:[#allocation10 + $0x610] sm:$0xff]  ;;  %1022 = vmatpush2.msra.mxu1 %v911_v14  ;;  %v608_v59 = vpop.permute.xlu0 %607 }
 0x104   : > { %1050 = vmatprep.subr.mxu0 %v826_v16  ;;  %v904_v16 = vld [vmem:[#allocation10 + $0x5c8] sm:$0xff] }
 0x105   : > { %1051 = vmatpush1.msra.mxu0 %v825_v17  ;;  %v906_v17 = vld [vmem:[#allocation10 + $0x5d8] sm:$0xff]  ;;  %1023 = vmatprep.subr.mxu1 %v904_v16 }
 0x106   : > { %1052 = vmatprep.subr.mxu0 %v818_v18  ;;  %v903_v18 = vld [vmem:[#allocation10 + $0x5c0] sm:$0xff]  ;;  %v838_v16 = vld [vmem:[#allocation10 + $0x3b8] sm:$0xff] }
 0x107   : > { %1053 = vmatpush1.msra.mxu0 %v817_v19  ;;  %v905_v19 = vld [vmem:[#allocation10 + $0x5d0] sm:$0xff]  ;;  %1024 = vmatpush2.msra.mxu1 %v903_v18 }
 0x108   : > { %1054 = vmatprep.subr.mxu0 %v810_v20  ;;  %v896_v20 = vld [vmem:[#allocation10 + $0x588] sm:$0xff]  ;;  %v837_v18 = vld [vmem:[#allocation10 + $0x3b0] sm:$0xff] }
 0x109   : > { %1055 = vmatpush1.msra.mxu0 %v809_v21  ;;  %v898_v21 = vld [vmem:[#allocation10 + $0x598] sm:$0xff]  ;;  %1025 = vmatprep.subr.mxu1 %v896_v20 }
 0x10a   : > { %1056 = vmatprep.subr.mxu0 %v802_v22  ;;  %v895_v22 = vld [vmem:[#allocation10 + $0x580] sm:$0xff]  ;;  %v830_v20 = vld [vmem:[#allocation10 + $0x378] sm:$0xff] }
 0x10b   : > { %1057 = vmatpush1.msra.mxu0 %v801_v23  ;;  %v897_v23 = vld [vmem:[#allocation10 + $0x590] sm:$0xff]  ;;  %1026 = vmatpush2.msra.mxu1 %v895_v22 }
 0x10c   : > { %1058 = vmatprep.subr.mxu0 %v794_v24  ;;  %v888_v24 = vld [vmem:[#allocation10 + $0x548] sm:$0xff]  ;;  %v829_v22 = vld [vmem:[#allocation10 + $0x370] sm:$0xff] }
 0x10d   : > { %1059 = vmatpush1.msra.mxu0 %v793_v26  ;;  %v890_v26 = vld [vmem:[#allocation10 + $0x558] sm:$0xff]  ;;  %1027 = vmatprep.subr.mxu1 %v888_v24 }
 0x10e   : > { %1060 = vmatprep.subr.mxu0 %v786_v27  ;;  %v887_v27 = vld [vmem:[#allocation10 + $0x540] sm:$0xff]  ;;  %v822_v24 = vld [vmem:[#allocation10 + $0x338] sm:$0xff] }
 0x10f   : > { %1061 = vmatpush1.msra.mxu0 %v785_v29  ;;  %v889_v29 = vld [vmem:[#allocation10 + $0x550] sm:$0xff]  ;;  %1028 = vmatpush2.msra.mxu1 %v887_v27 }
 0x110   : > { %1062 = vmatprep.subr.mxu0 %v778_v30  ;;  %v880_v30 = vld [vmem:[#allocation10 + $0x508] sm:$0xff]  ;;  %v821_v27 = vld [vmem:[#allocation10 + $0x330] sm:$0xff] }
 0x111   : > { %1063 = vmatpush1.msra.mxu0 %v777_v31  ;;  %v882_v31 = vld [vmem:[#allocation10 + $0x518] sm:$0xff]  ;;  %1029 = vmatprep.subr.mxu1 %v880_v30 }
 0x112   : > { %1064 = vmatprep.subr.mxu0 %v770_v32  ;;  %v879_v32 = vld [vmem:[#allocation10 + $0x500] sm:$0xff]  ;;  %v814_v30 = vld [vmem:[#allocation10 + $0x2f8] sm:$0xff] }
 0x113   : > { %1065 = vmatpush1.msra.mxu0 %v769_v33  ;;  %v881_v33 = vld [vmem:[#allocation10 + $0x510] sm:$0xff]  ;;  %1030 = vmatpush2.msra.mxu1 %v879_v32 }
 0x114   : > { %1066 = vmatprep.subr.mxu0 %v762_v34  ;;  %v872_v34 = vld [vmem:[#allocation10 + $0x4c8] sm:$0xff]  ;;  %v813_v32 = vld [vmem:[#allocation10 + $0x2f0] sm:$0xff] }
 0x115   : > { %1067 = vmatpush1.msra.mxu0 %v761_v35  ;;  %v874_v35 = vld [vmem:[#allocation10 + $0x4d8] sm:$0xff]  ;;  %1031 = vmatprep.subr.mxu1 %v872_v34 }
 0x116   : > { %1068 = vmatprep.subr.mxu0 %v754_v36  ;;  %v871_v36 = vld [vmem:[#allocation10 + $0x4c0] sm:$0xff]  ;;  %v806_v34 = vld [vmem:[#allocation10 + $0x2b8] sm:$0xff] }
 0x117   : > { %1069 = vmatpush1.msra.mxu0 %v753_v37  ;;  %v873_v37 = vld [vmem:[#allocation10 + $0x4d0] sm:$0xff]  ;;  %1032 = vmatpush2.msra.mxu1 %v871_v36 }
 0x118   : > { %1070 = vmatprep.subr.mxu0 %v746_v38  ;;  %v864_v38 = vld [vmem:[#allocation10 + $0x488] sm:$0xff]  ;;  %v805_v36 = vld [vmem:[#allocation10 + $0x2b0] sm:$0xff] }
 0x119   : > { %1071 = vmatpush1.msra.mxu0 %v745_v2  ;;  %v866_v2 = vld [vmem:[#allocation10 + $0x498] sm:$0xff]  ;;  %1033 = vmatprep.subr.mxu1 %v864_v38 }
 0x11a   : > { %1072 = vmatprep.subr.mxu0 %v738_v1  ;;  %v863_v1 = vld [vmem:[#allocation10 + $0x480] sm:$0xff]  ;;  %v798_v38 = vld [vmem:[#allocation10 + $0x278] sm:$0xff] }
 0x11b   : > { %1073 = vmatpush1.msra.mxu0 %v737_v39  ;;  %v865_v39 = vld [vmem:[#allocation10 + $0x490] sm:$0xff]  ;;  %1034 = vmatpush2.msra.mxu1 %v863_v1 }
 0x11c   : > { %1074 = vmatprep.subr.mxu0 %v730_v40  ;;  %v856_v40 = vld [vmem:[#allocation10 + $0x448] sm:$0xff]  ;;  %v797_v1 = vld [vmem:[#allocation10 + $0x270] sm:$0xff] }
 0x11d   : > { %1075 = vmatpush1.msra.mxu0 %v729_v43  ;;  %v858_v43 = vld [vmem:[#allocation10 + $0x458] sm:$0xff]  ;;  %1035 = vmatprep.subr.mxu1 %v856_v40 }
 0x11e   : > { %1076 = vmatprep.subr.mxu0 %v722_v46  ;;  %v855_v46 = vld [vmem:[#allocation10 + $0x440] sm:$0xff]  ;;  %v790_v40 = vld [vmem:[#allocation10 + $0x238] sm:$0xff] }
 0x11f   : > { %1077 = vmatpush1.msra.mxu0 %v721_v47  ;;  %v857_v47 = vld [vmem:[#allocation10 + $0x450] sm:$0xff]  ;;  %1036 = vmatpush2.msra.mxu1 %v855_v46 }
 0x120   : > { %1078 = vmatprep.subr.mxu0 %v970_v52  ;;  %v848_v52 = vld [vmem:[#allocation10 + $0x408] sm:$0xff]  ;;  %v789_v46 = vld [vmem:[#allocation10 + $0x230] sm:$0xff] }
 0x121   : > { %1079 = vmatpush2.msra.mxu0 %v969_v53  ;;  %v850_v53 = vld [vmem:[#allocation10 + $0x418] sm:$0xff]  ;;  %1037 = vmatprep.subr.mxu1 %v848_v52 }
 0x122   : > { %1080 = vmatprep.subr.mxu0 %v962_v54  ;;  %v847_v54 = vld [vmem:[#allocation10 + $0x400] sm:$0xff]  ;;  %v782_v52 = vld [vmem:[#allocation10 + $0x1f8] sm:$0xff] }
 0x123   : > { %1081 = vmatpush2.msra.mxu0 %v961_v55  ;;  %v849_v55 = vld [vmem:[#allocation10 + $0x410] sm:$0xff]  ;;  %1038 = vmatpush2.msra.mxu1 %v847_v54 }
 0x124   : > { %1082 = vmatprep.subr.mxu0 %v954_v56  ;;  %v844_v56 = vld [vmem:[#allocation10 + $0x3e8] sm:$0xff]  ;;  %v781_v54 = vld [vmem:[#allocation10 + $0x1f0] sm:$0xff] }
 0x125   : > { %1083 = vmatpush2.msra.mxu0 %v953_v58  ;;  %v846_v58 = vld [vmem:[#allocation10 + $0x3f8] sm:$0xff]  ;;  %1117 = vmatprep.subr.mxu1 %v844_v56 }
 0x126   : > { %1084 = vmatprep.subr.mxu0 %v946_v60  ;;  %v774_v56 = vld [vmem:[#allocation10 + $0x1b8] sm:$0xff] }
 0x127   : > { %1085 = vmatpush2.msra.mxu0 %v945_v62 }
 0x128   : > { %1086 = vmatprep.subr.mxu0 %v938_v0 }
 0x129   : > { %1087 = vmatpush2.msra.mxu0 %v937_v5 }
 0x12a   : > { %1088 = vmatprep.subr.mxu0 %v930_v7 }
 0x12b   : > { %1089 = vmatpush2.msra.mxu0 %v929_v9 }
 0x12c   : > { %1090 = vmatprep.subr.mxu0 %v922_v11 }
 0x12d   : > { %1091 = vmatpush2.msra.mxu0 %v921_v13 }
 0x12e   : > { %1092 = vmatprep.subr.mxu0 %v914_v51  ;;  %v845_v51 = vld [vmem:[#allocation10 + $0x3f0] sm:$0xff] }
 0x12f   : > { %1093 = vmatpush2.msra.mxu0 %v913_v15  ;;  %v836_v15 = vld [vmem:[#allocation10 + $0x3a8] sm:$0xff] }
 0x130   : > { %1094 = vmatprep.subr.mxu0 %v906_v17  ;;  %v835_v17 = vld [vmem:[#allocation10 + $0x3a0] sm:$0xff] }
 0x131   : > { %1095 = vmatpush2.msra.mxu0 %v905_v19  ;;  %v828_v19 = vld [vmem:[#allocation10 + $0x368] sm:$0xff] }
 0x132   : > { %1096 = vmatprep.subr.mxu0 %v898_v21  ;;  %v827_v21 = vld [vmem:[#allocation10 + $0x360] sm:$0xff] }
 0x133   : > { %1097 = vmatpush2.msra.mxu0 %v897_v23  ;;  %v820_v23 = vld [vmem:[#allocation10 + $0x328] sm:$0xff] }
 0x134   : > { %1098 = vmatprep.subr.mxu0 %v890_v26  ;;  %v819_v26 = vld [vmem:[#allocation10 + $0x320] sm:$0xff] }
 0x135   : > { %1099 = vmatpush2.msra.mxu0 %v889_v29  ;;  %v812_v29 = vld [vmem:[#allocation10 + $0x2e8] sm:$0xff] }
 0x136   : > { %1100 = vmatprep.subr.mxu0 %v882_v31  ;;  %v811_v31 = vld [vmem:[#allocation10 + $0x2e0] sm:$0xff] }
 0x137   : > { %1101 = vmatpush2.msra.mxu0 %v881_v33  ;;  %v804_v33 = vld [vmem:[#allocation10 + $0x2a8] sm:$0xff] }
 0x138   : > { %1102 = vmatprep.subr.mxu0 %v874_v35  ;;  %v803_v35 = vld [vmem:[#allocation10 + $0x2a0] sm:$0xff] }
 0x139   : > { %1103 = vmatpush2.msra.mxu0 %v873_v37  ;;  %v796_v37 = vld [vmem:[#allocation10 + $0x268] sm:$0xff] }
 0x13a   : > { %1104 = vmatprep.subr.mxu0 %v866_v2  ;;  %v795_v2 = vld [vmem:[#allocation10 + $0x260] sm:$0xff] }
 0x13b   : > { %1105 = vmatpush2.msra.mxu0 %v865_v39  ;;  %v788_v39 = vld [vmem:[#allocation10 + $0x228] sm:$0xff] }
 0x13c   : > { %1106 = vmatprep.subr.mxu0 %v858_v43  ;;  %v787_v43 = vld [vmem:[#allocation10 + $0x220] sm:$0xff] }
 0x13d   : > { %1107 = vmatpush2.msra.mxu0 %v857_v47  ;;  %v780_v47 = vld [vmem:[#allocation10 + $0x1e8] sm:$0xff] }
 0x13e   : > { %1108 = vmatprep.subr.mxu0 %v850_v53  ;;  %v779_v53 = vld [vmem:[#allocation10 + $0x1e0] sm:$0xff] }
 0x13f   : > { %1109 = vmatpush2.msra.mxu0 %v849_v55  ;;  %v772_v55 = vld [vmem:[#allocation10 + $0x1a8] sm:$0xff] }
 0x140   : > { %1188 = vmatprep.subr.mxu0 %v846_v58  ;;  %v771_v58 = vld [vmem:[#allocation10 + $0x1a0] sm:$0xff] }
 0x1c0   : > { %v700_v60 = vpop.f32.mrf.mxu0 }
 0x1c1   : > { %v701_v61 = vadd.f32 %v700_v60, %v608_v59  ;;  %v764_v60 = vld [vmem:[#allocation10 + $0x168] sm:$0xff] }
 0x1c2   : > { %v702_v62 = vpop.f32.mrf.mxu0 }
 0x1c3   : > { %v709_v63 = vmin.f32 %v701_v61, 0.0  ;;  %v703_v0 = vadd.f32 %v702_v62, %v608_v59  ;;  %vm707_vm11 = vcmp.gt.f32.partialorder %v701_v61, 0.0  ;;  %v773_v59 = vld [vmem:[#allocation10 + $0x1b0] sm:$0xff]  ;;  %v763_v62 = vld [vmem:[#allocation10 + $0x160] sm:$0xff] }
 0x1c4   : > { %v704_v4 = vpop.f32.mrf.mxu0 }
 0x1c5   : > { %v711_v5 = vmul.f32 1.442695, %v709_v63  ;;  %v710_v6 = vmin.f32 %v703_v0, 0.0  ;;  %vm708_vm10 = vcmp.gt.f32.partialorder %v703_v0, 0.0  ;;  %v765_v63 = vld [vmem:[#allocation10 + $0x170] sm:$0xff]  ;;  %v758_v4 = vld [vmem:[#allocation10 + $0x138] sm:$0xff] }
 0x1c6   : > { %v705_v7 = vpop.f32.mrf.mxu0 }
 0x1c7   : > { %2983 = vpow2.f32 %v711_v5  ;;  %v713_v8 = vmul.f32 1.442695, %v710_v6  ;;  %v755_v5 = vld [vmem:[#allocation10 + $0x120] sm:$0xff]  ;;  %v757_v6 = vld [vmem:[#allocation10 + $0x130] sm:$0xff]  ;;  %v748_v7 = vld [vmem:[#allocation10 + $0xe8] sm:$0xff] }
 0x1c9   : > { %2985 = vpow2.f32 %v713_v8  ;;  %v750_v8 = vld [vmem:[#allocation10 + $0xf8] sm:$0xff] }
 0x1d4   : > { %v2984_v9 = vpop.eup %2983 }
 0x1d5   : > { %v2716_v11 = vadd.f32 -1.0, %v2984_v9  ;;  %v747_v9 = vld [vmem:[#allocation10 + $0xe0] sm:$0xff] }
 0x1d6   : > { %v2986_v10 = vpop.eup %2985 }
 0x1d7   : > { %v2717_v12 = vadd.f32 -1.0, %v2986_v10  ;;  %v3529_v14 = vsel %vm707_vm11, %v701_v61, %v2716_v11  ;;  %v766_v61 = vld [vmem:[#allocation10 + $0x178] sm:$0xff]  ;;  %v749_v10 = vld [vmem:[#allocation10 + $0xf0] sm:$0xff]  ;;  %v740_v11 = vld [vmem:[#allocation10 + $0xa8] sm:$0xff] }
 0x1d9   : > { %v718_v13 = vsel %vm708_vm10, %v703_v0, %v2717_v12  ;;  %v756_v0 = vld [vmem:[#allocation10 + $0x128] sm:$0xff]  ;;  %v742_v12 = vld [vmem:[#allocation10 + $0xb8] sm:$0xff] }
 0x1da   : > { %1039 = vmatprep.mubr.f32.mxu1 %v718_v13  ;;  %1110 = vmatprep.mubr.f32.mxu0 %v718_v13 }
 0x1db   : > { %1040 = vmatmul.mubr.f32.vlgmr.msra.gmra.mxu1 %v3529_v14  ;;  %1111 = vmatmul.mubr.f32.vlgmr.msra.gmra.mxu0 %v3529_v14 }
 0x1dc   : > { %1118 = vmatpush1.msra.mxu1 %v843_v49  ;;  %1189 = vmatpush1.msra.mxu0 %v845_v51  ;;  %v741_v49 = vld [vmem:[#allocation10 + $0xb0] sm:$0xff]  ;;  %v732_v51 = vld [vmem:[#allocation10 + $0x68] sm:$0xff] }
 0x1dd   : > { %1119 = vmatprep.subr.mxu1 %v836_v15  ;;  %1181 = vmatprep.mubr.f32.mxu1 %v718_v13  ;;  %v734_v15 = vld [vmem:[#allocation10 + $0x78] sm:$0xff] }
 0x1de   : > { %1190 = vmatprep.subr.mxu0 %v838_v16  ;;  %1252 = vmatprep.mubr.f32.mxu0 %v718_v13  ;;  %v739_v13 = vld [vmem:[#allocation10 + $0xa0] sm:$0xff] }
 0x1df   : > { %1120 = vmatpush1.msra.mxu1 %v835_v17  ;;  %1191 = vmatpush1.msra.mxu0 %v837_v18  ;;  %v731_v16 = vld [vmem:[#allocation10 + $0x60] sm:$0xff]  ;;  %v733_v17 = vld [vmem:[#allocation10 + $0x70] sm:$0xff]  ;;  %v724_v18 = vld [vmem:[#allocation10 + $0x28] sm:$0xff] }
 0x1e0   : > { %1121 = vmatprep.subr.mxu1 %v828_v19  ;;  %1192 = vmatprep.subr.mxu0 %v830_v20  ;;  %v726_v19 = vld [vmem:[#allocation10 + $0x38] sm:$0xff]  ;;  %v723_v20 = vld [vmem:[#allocation10 + $0x20] sm:$0xff] }
 0x1e1   : > { %1122 = vmatpush1.msra.mxu1 %v827_v21  ;;  %1193 = vmatpush1.msra.mxu0 %v829_v22  ;;  %v725_v21 = vld [vmem:[#allocation10 + $0x30] sm:$0xff]  ;;  %v972_v22 = vld [vmem:[#allocation10 + $0x7e8] sm:$0xff] }
 0x1e2   : > { %1123 = vmatprep.subr.mxu1 %v820_v23  ;;  %1194 = vmatprep.subr.mxu0 %v822_v24  ;;  %v974_v23 = vld [vmem:[#allocation10 + $0x7f8] sm:$0xff]  ;;  %v971_v24 = vld [vmem:[#allocation10 + $0x7e0] sm:$0xff] }
 0x1e3   : > { %1124 = vmatpush1.msra.mxu1 %v819_v26  ;;  %1195 = vmatpush1.msra.mxu0 %v821_v27  ;;  %v973_v26 = vld [vmem:[#allocation10 + $0x7f0] sm:$0xff]  ;;  %v964_v27 = vld [vmem:[#allocation10 + $0x7a8] sm:$0xff] }
 0x1e4   : > { %1125 = vmatprep.subr.mxu1 %v812_v29  ;;  %1196 = vmatprep.subr.mxu0 %v814_v30  ;;  %v966_v29 = vld [vmem:[#allocation10 + $0x7b8] sm:$0xff]  ;;  %v963_v30 = vld [vmem:[#allocation10 + $0x7a0] sm:$0xff] }
 0x1e5   : > { %1126 = vmatpush1.msra.mxu1 %v811_v31  ;;  %1197 = vmatpush1.msra.mxu0 %v813_v32  ;;  %v965_v31 = vld [vmem:[#allocation10 + $0x7b0] sm:$0xff]  ;;  %v956_v32 = vld [vmem:[#allocation10 + $0x768] sm:$0xff] }
 0x1e6   : > { %1127 = vmatprep.subr.mxu1 %v804_v33  ;;  %1198 = vmatprep.subr.mxu0 %v806_v34  ;;  %v958_v33 = vld [vmem:[#allocation10 + $0x778] sm:$0xff]  ;;  %v955_v34 = vld [vmem:[#allocation10 + $0x760] sm:$0xff] }
 0x1e7   : > { %1128 = vmatpush1.msra.mxu1 %v803_v35  ;;  %1199 = vmatpush1.msra.mxu0 %v805_v36  ;;  %v957_v35 = vld [vmem:[#allocation10 + $0x770] sm:$0xff]  ;;  %v948_v36 = vld [vmem:[#allocation10 + $0x728] sm:$0xff] }
 0x1e8   : > { %1129 = vmatprep.subr.mxu1 %v796_v37  ;;  %1200 = vmatprep.subr.mxu0 %v798_v38  ;;  %v950_v37 = vld [vmem:[#allocation10 + $0x738] sm:$0xff]  ;;  %v947_v38 = vld [vmem:[#allocation10 + $0x720] sm:$0xff] }
 0x1e9   : > { %1130 = vmatpush1.msra.mxu1 %v795_v2  ;;  %1201 = vmatpush1.msra.mxu0 %v797_v1  ;;  %v949_v2 = vld [vmem:[#allocation10 + $0x730] sm:$0xff]  ;;  %v940_v1 = vld [vmem:[#allocation10 + $0x6e8] sm:$0xff] }
 0x1ea   : > { %1131 = vmatprep.subr.mxu1 %v788_v39  ;;  %1202 = vmatprep.subr.mxu0 %v790_v40  ;;  %v942_v39 = vld [vmem:[#allocation10 + $0x6f8] sm:$0xff]  ;;  %v939_v40 = vld [vmem:[#allocation10 + $0x6e0] sm:$0xff] }
 0x1eb   : > { %1132 = vmatpush1.msra.mxu1 %v787_v43  ;;  %1203 = vmatpush1.msra.mxu0 %v789_v46  ;;  %v941_v43 = vld [vmem:[#allocation10 + $0x6f0] sm:$0xff]  ;;  %v932_v46 = vld [vmem:[#allocation10 + $0x6a8] sm:$0xff] }
 0x1ec   : > { %1133 = vmatprep.subr.mxu1 %v780_v47  ;;  %1204 = vmatprep.subr.mxu0 %v782_v52  ;;  %v934_v47 = vld [vmem:[#allocation10 + $0x6b8] sm:$0xff]  ;;  %v931_v52 = vld [vmem:[#allocation10 + $0x6a0] sm:$0xff] }
 0x1ed   : > { %1134 = vmatpush1.msra.mxu1 %v779_v53  ;;  %1205 = vmatpush1.msra.mxu0 %v781_v54  ;;  %v933_v53 = vld [vmem:[#allocation10 + $0x6b0] sm:$0xff]  ;;  %v924_v54 = vld [vmem:[#allocation10 + $0x668] sm:$0xff] }
 0x1ee   : > { %1135 = vmatprep.subr.mxu1 %v772_v55  ;;  %1206 = vmatprep.subr.mxu0 %v774_v56  ;;  %v926_v55 = vld [vmem:[#allocation10 + $0x678] sm:$0xff]  ;;  %v923_v56 = vld [vmem:[#allocation10 + $0x660] sm:$0xff] }
 0x1ef   : > { %1136 = vmatpush1.msra.mxu1 %v771_v58  ;;  %1207 = vmatpush1.msra.mxu0 %v773_v59  ;;  %v925_v58 = vld [vmem:[#allocation10 + $0x670] sm:$0xff]  ;;  %v916_v59 = vld [vmem:[#allocation10 + $0x628] sm:$0xff] }
 0x1f0   : > { %1137 = vmatprep.subr.mxu1 %v764_v60  ;;  %1208 = vmatprep.subr.mxu0 %v766_v61  ;;  %v918_v60 = vld [vmem:[#allocation10 + $0x638] sm:$0xff]  ;;  %v915_v61 = vld [vmem:[#allocation10 + $0x620] sm:$0xff] }
 0x1f1   : > { %1138 = vmatpush1.msra.mxu1 %v763_v62  ;;  %1209 = vmatpush1.msra.mxu0 %v765_v63  ;;  %v917_v62 = vld [vmem:[#allocation10 + $0x630] sm:$0xff]  ;;  %v908_v63 = vld [vmem:[#allocation10 + $0x5e8] sm:$0xff] }
 0x1f2   : > { %1139 = vmatprep.subr.mxu1 %v756_v0  ;;  %1210 = vmatprep.subr.mxu0 %v758_v4  ;;  %v910_v0 = vld [vmem:[#allocation10 + $0x5f8] sm:$0xff]  ;;  %v907_v4 = vld [vmem:[#allocation10 + $0x5e0] sm:$0xff] }
 0x1f3   : > { %1140 = vmatpush1.msra.mxu1 %v755_v5  ;;  %1211 = vmatpush1.msra.mxu0 %v757_v6  ;;  %v909_v5 = vld [vmem:[#allocation10 + $0x5f0] sm:$0xff]  ;;  %v900_v6 = vld [vmem:[#allocation10 + $0x5a8] sm:$0xff] }
 0x1f4   : > { %1141 = vmatprep.subr.mxu1 %v748_v7  ;;  %1212 = vmatprep.subr.mxu0 %v750_v8  ;;  %v902_v7 = vld [vmem:[#allocation10 + $0x5b8] sm:$0xff]  ;;  %v899_v8 = vld [vmem:[#allocation10 + $0x5a0] sm:$0xff] }
 0x1f5   : > { %1142 = vmatpush1.msra.mxu1 %v747_v9  ;;  %1213 = vmatpush1.msra.mxu0 %v749_v10  ;;  %v901_v9 = vld [vmem:[#allocation10 + $0x5b0] sm:$0xff]  ;;  %v892_v10 = vld [vmem:[#allocation10 + $0x568] sm:$0xff] }
 0x1f6   : > { %1143 = vmatprep.subr.mxu1 %v740_v11  ;;  %1214 = vmatprep.subr.mxu0 %v742_v12  ;;  %v894_v11 = vld [vmem:[#allocation10 + $0x578] sm:$0xff]  ;;  %v891_v12 = vld [vmem:[#allocation10 + $0x560] sm:$0xff] }
 0x1f7   : > { %1144 = vmatpush1.msra.mxu1 %v739_v13  ;;  %1215 = vmatpush1.msra.mxu0 %v741_v49  ;;  %v893_v13 = vld [vmem:[#allocation10 + $0x570] sm:$0xff]  ;;  %v884_v49 = vld [vmem:[#allocation10 + $0x528] sm:$0xff] }
 0x1f8   : > { %1145 = vmatprep.subr.mxu1 %v732_v51  ;;  %1216 = vmatprep.subr.mxu0 %v734_v15  ;;  %v886_v51 = vld [vmem:[#allocation10 + $0x538] sm:$0xff]  ;;  %v883_v15 = vld [vmem:[#allocation10 + $0x520] sm:$0xff] }
 0x1f9   : > { %1146 = vmatpush1.msra.mxu1 %v731_v16  ;;  %1217 = vmatpush1.msra.mxu0 %v733_v17  ;;  %v885_v16 = vld [vmem:[#allocation10 + $0x530] sm:$0xff]  ;;  %v876_v17 = vld [vmem:[#allocation10 + $0x4e8] sm:$0xff] }
 0x1fa   : > { %1147 = vmatprep.subr.mxu1 %v724_v18  ;;  %1218 = vmatprep.subr.mxu0 %v726_v19  ;;  %v878_v18 = vld [vmem:[#allocation10 + $0x4f8] sm:$0xff]  ;;  %v875_v19 = vld [vmem:[#allocation10 + $0x4e0] sm:$0xff] }
 0x1fb   : > { %1148 = vmatpush1.msra.mxu1 %v723_v20  ;;  %1219 = vmatpush1.msra.mxu0 %v725_v21  ;;  %v877_v20 = vld [vmem:[#allocation10 + $0x4f0] sm:$0xff]  ;;  %v868_v21 = vld [vmem:[#allocation10 + $0x4a8] sm:$0xff] }
 0x1fc   : > { %1149 = vmatprep.subr.mxu1 %v972_v22  ;;  %1220 = vmatprep.subr.mxu0 %v974_v23  ;;  %v870_v22 = vld [vmem:[#allocation10 + $0x4b8] sm:$0xff]  ;;  %v867_v23 = vld [vmem:[#allocation10 + $0x4a0] sm:$0xff] }
 0x1fd   : > { %1150 = vmatpush2.msra.mxu1 %v971_v24  ;;  %1221 = vmatpush2.msra.mxu0 %v973_v26  ;;  %v869_v24 = vld [vmem:[#allocation10 + $0x4b0] sm:$0xff]  ;;  %v860_v26 = vld [vmem:[#allocation10 + $0x468] sm:$0xff] }
 0x1fe   : > { %1151 = vmatprep.subr.mxu1 %v964_v27  ;;  %1222 = vmatprep.subr.mxu0 %v966_v29  ;;  %v862_v27 = vld [vmem:[#allocation10 + $0x478] sm:$0xff]  ;;  %v859_v29 = vld [vmem:[#allocation10 + $0x460] sm:$0xff] }
 0x1ff   : > { %1152 = vmatpush2.msra.mxu1 %v963_v30  ;;  %1223 = vmatpush2.msra.mxu0 %v965_v31  ;;  %v861_v30 = vld [vmem:[#allocation10 + $0x470] sm:$0xff]  ;;  %v852_v31 = vld [vmem:[#allocation10 + $0x428] sm:$0xff] }
 0x200   : > { %1153 = vmatprep.subr.mxu1 %v956_v32  ;;  %1224 = vmatprep.subr.mxu0 %v958_v33  ;;  %v854_v32 = vld [vmem:[#allocation10 + $0x438] sm:$0xff]  ;;  %v851_v33 = vld [vmem:[#allocation10 + $0x420] sm:$0xff] }
 0x201   : > { %1154 = vmatpush2.msra.mxu1 %v955_v34  ;;  %1225 = vmatpush2.msra.mxu0 %v957_v35  ;;  %v853_v34 = vld [vmem:[#allocation10 + $0x430] sm:$0xff] }
 0x202   : > { %1155 = vmatprep.subr.mxu1 %v948_v36  ;;  %1226 = vmatprep.subr.mxu0 %v950_v37 }
 0x203   : > { %1156 = vmatpush2.msra.mxu1 %v947_v38  ;;  %1227 = vmatpush2.msra.mxu0 %v949_v2 }
 0x204   : > { %1157 = vmatprep.subr.mxu1 %v940_v1  ;;  %1228 = vmatprep.subr.mxu0 %v942_v39 }
 0x205   : > { %1158 = vmatpush2.msra.mxu1 %v939_v40  ;;  %1229 = vmatpush2.msra.mxu0 %v941_v43 }
 0x206   : > { %1159 = vmatprep.subr.mxu1 %v932_v46  ;;  %1230 = vmatprep.subr.mxu0 %v934_v47 }
 0x207   : > { %1160 = vmatpush2.msra.mxu1 %v931_v52  ;;  %1231 = vmatpush2.msra.mxu0 %v933_v53 }
 0x208   : > { %1161 = vmatprep.subr.mxu1 %v924_v54  ;;  %1232 = vmatprep.subr.mxu0 %v926_v55 }
 0x209   : > { %1162 = vmatpush2.msra.mxu1 %v923_v56  ;;  %1233 = vmatpush2.msra.mxu0 %v925_v58  ;;  %v2154_v56 = vld [vmem:[#allocation4] sm:$0x1] }
 0x20a   : > { %1163 = vmatprep.subr.mxu1 %v916_v59  ;;  %1234 = vmatprep.subr.mxu0 %v918_v60 }
 0x20b   : > { %1164 = vmatpush2.msra.mxu1 %v915_v61  ;;  %1235 = vmatpush2.msra.mxu0 %v917_v62 }
 0x20c   : > { %1165 = vmatprep.subr.mxu1 %v908_v63  ;;  %1236 = vmatprep.subr.mxu0 %v910_v0 }
 0x20d   : > { %1166 = vmatpush2.msra.mxu1 %v907_v4  ;;  %1237 = vmatpush2.msra.mxu0 %v909_v5 }
 0x20e   : > { %1167 = vmatprep.subr.mxu1 %v900_v6  ;;  %1238 = vmatprep.subr.mxu0 %v902_v7  ;;  %v2750_v7 = vld [vmem:[#allocation11 + $0x40] ss:$0 sm:$0xff] }
 0x20f   : > { %1168 = vmatpush2.msra.mxu1 %v899_v8  ;;  %1239 = vmatpush2.msra.mxu0 %v901_v9  ;;  %v2751_v8 = vld [vmem:[#allocation11 + $0x48] ss:$0 sm:$0xff]  ;;  %v3630_v9 = vld [vmem:[#allocation11] sm:$0xff] }
 0x210   : > { %1169 = vmatprep.subr.mxu1 %v892_v10  ;;  %1240 = vmatprep.subr.mxu0 %v894_v11  ;;  %v3632_v10 = vld [vmem:[#allocation11 + $0x8] sm:$0xff] }
 0x211   : > { %1170 = vmatpush2.msra.mxu1 %v891_v12  ;;  %1241 = vmatpush2.msra.mxu0 %v893_v13 }
 0x212   : > { %1171 = vmatprep.subr.mxu1 %v884_v49  ;;  %1242 = vmatprep.subr.mxu0 %v886_v51 }
 0x213   : > { %1172 = vmatpush2.msra.mxu1 %v883_v15  ;;  %1243 = vmatpush2.msra.mxu0 %v885_v16  ;;  %v1955_v16 = vrot.slane %v3630_v9, %v3453_v50 }
 0x214   : > { %1173 = vmatprep.subr.mxu1 %v876_v17  ;;  %1244 = vmatprep.subr.mxu0 %v878_v18  ;;  %v1959_v17 = vrot.slane %v3632_v10, %v3453_v50 }
 0x215   : > { %1174 = vmatpush2.msra.mxu1 %v875_v19  ;;  %1245 = vmatpush2.msra.mxu0 %v877_v20 }
 0x216   : > { %1175 = vmatprep.subr.mxu1 %v868_v21  ;;  %1246 = vmatprep.subr.mxu0 %v870_v22 }
 0x217   : > { %1176 = vmatpush2.msra.mxu1 %v867_v23  ;;  %1247 = vmatpush2.msra.mxu0 %v869_v24 }
 0x218   : > { %1177 = vmatprep.subr.mxu1 %v860_v26  ;;  %1248 = vmatprep.subr.mxu0 %v862_v27  ;;  %v1749_v26 = vrot.slane %v3630_v9, %v3463_v57  ;;  %v1753_v27 = vrot.slane %v3632_v10, %v3463_v57 }
 0x219   : > { %1178 = vmatpush2.msra.mxu1 %v859_v29  ;;  %1249 = vmatpush2.msra.mxu0 %v861_v30 }
 0x21a   : > { %1179 = vmatprep.subr.mxu1 %v852_v31  ;;  %1250 = vmatprep.subr.mxu0 %v854_v32 }
 0x21b   : > { %1180 = vmatpush2.msra.mxu1 %v851_v33  ;;  %1251 = vmatpush2.msra.mxu0 %v853_v34  ;;  %v1854_v34 = vrot.slane %v3630_v9, %v3448_v48 }
 0x21c   : > { %1182 = vmatmul.mubr.f32.vlgmr.msra.gmra.mxu1 %v3529_v14  ;;  %1253 = vmatmul.mubr.f32.vlgmr.msra.gmra.mxu0 %v3529_v14 }
 0x21d   : > { %2325 = vmatprep.mubr.bf16.mxu1 %v4161_v3  ;;  %2407 = vmatprep.mubr.bf16.mxu0 %v4161_v3 }
 0x29b   : > { %v1041_v35 = vpop.f32.mrf.mxu1  ;;  %v1112_v36 = vpop.f32.mrf.mxu0 }
 0x29c   : > { %2036 = vrot.lane.b32.xlu0 %v1112_v36, %s3216_s23  ;;  %2032 = vrot.lane.b32.xlu1 %v1041_v35, %s3216_s23 }
 0x29d   : > { %v1043_v37 = vpop.f32.mrf.mxu1  ;;  %v1114_v38 = vpop.f32.mrf.mxu0 }
 0x29e   : > { %v2825_v2 = vpack.c.bf16 %v1043_v37, %v1041_v35  ;;  %v2826_v1 = vpack.c.bf16 %v1114_v38, %v1112_v36 }
 0x2a0   : > { %1718 = vst [vmem:[#allocation3 + $0x8] sm:$0x33] %v2825_v2  ;;  %1719 = vst [vmem:[#allocation3 + $0x88] sm:$0x33] %v2826_v1  ;;  %1927 = vrot.lane.b32.xlu0 %v1041_v35, %s3217_s28  ;;  %1722 = vrot.lane.b32.xlu1 %v1041_v35, %s3210_s26  ;;  %v1858_v2 = vrot.slane %v3632_v10, %v3448_v48  ;;  %v3674_v1 = vld [vmem:[#allocation11 + $0x18] sm:$0xff] }
 0x2a4   : > { %1931 = vrot.lane.b32.xlu0 %v1112_v36, %s3217_s28  ;;  %1726 = vrot.lane.b32.xlu1 %v1112_v36, %s3210_s26 }
 0x2a8   : > { %1376 = vrot.lane.b32.xlu0 %v1041_v35, %s3218_s3  ;;  %1826 = vrot.lane.b32.xlu1 %v1041_v35, %s3219_s4 }
 0x2ac   : > { %1275 = vrot.lane.b32.xlu0 %v1041_v35, %s3220_s14  ;;  %1830 = vrot.lane.b32.xlu1 %v1112_v36, %s3219_s4 }
 0x2b0   : > { %1380 = vrot.lane.b32.xlu0 %v1112_v36, %s3218_s3  ;;  %1582 = vrot.lane.b32.xlu1 %v1041_v35, %s3212_s21 }
 0x2b4   : > { %1586 = vrot.lane.b32.xlu0 %v1112_v36, %s3212_s21  ;;  %1481 = vrot.lane.b32.xlu1 %v1041_v35, %s3221_s12 }
 0x2b8   : > { %1279 = vrot.lane.b32.xlu0 %v1112_v36, %s3220_s14  ;;  %2034 = vrot.lane.b32.xlu1 %v1043_v37, %s3216_s23 }
 0x2bc   : > { %1485 = vrot.lane.b32.xlu0 %v1112_v36, %s3221_s12  ;;  %1929 = vrot.lane.b32.xlu1 %v1043_v37, %s3217_s28 }
 0x2c0   : > { %1724 = vrot.lane.b32.xlu0 %v1043_v37, %s3210_s26  ;;  %1378 = vrot.lane.b32.xlu1 %v1043_v37, %s3218_s3 }
 0x2c4   : > { %1828 = vrot.lane.b32.xlu0 %v1043_v37, %s3219_s4  ;;  %1277 = vrot.lane.b32.xlu1 %v1043_v37, %s3220_s14 }
 0x2c8   : > { %1584 = vrot.lane.b32.xlu0 %v1043_v37, %s3212_s21  ;;  %1382 = vrot.lane.b32.xlu1 %v1114_v38, %s3218_s3 }
 0x2cc   : > { %1483 = vrot.lane.b32.xlu0 %v1043_v37, %s3221_s12  ;;  %1588 = vrot.lane.b32.xlu1 %v1114_v38, %s3212_s21 }
 0x2d0   : > { %2038 = vrot.lane.b32.xlu0 %v1114_v38, %s3216_s23  ;;  %1281 = vrot.lane.b32.xlu1 %v1114_v38, %s3220_s14 }
 0x2d4   : > { %1728 = vrot.lane.b32.xlu0 %v1114_v38, %s3210_s26  ;;  %1487 = vrot.lane.b32.xlu1 %v1114_v38, %s3221_s12 }
 0x2d8   : > { %1933 = vrot.lane.b32.xlu0 %v1114_v38, %s3217_s28 }
 0x2dc   : > { %v1183_v14 = vpop.f32.mrf.mxu1  ;;  %v1254_v39 = vpop.f32.mrf.mxu0  ;;  %1832 = vrot.lane.b32.xlu0 %v1114_v38, %s3219_s4  ;;  %v3670_v38 = vld [vmem:[#allocation11 + $0x10] sm:$0xff] }
 0x2dd   : > { %2040 = vrot.lane.b32.xlu1 %v1183_v14, %s3216_s23 }
 0x2de   : > { %v1256_v40 = vpop.f32.mrf.mxu0  ;;  %v1185_v43 = vpop.f32.mrf.mxu1 }
 0x2df   : > { %v2828_v46 = vpack.c.bf16 %v1256_v40, %v1254_v39  ;;  %v2827_v47 = vpack.c.bf16 %v1185_v43, %v1183_v14 }
 0x2e0   : > { %1734 = vrot.lane.b32.xlu0 %v1254_v39, %s3210_s26 }
 0x2e1   : > { %1721 = vst [vmem:[#allocation3 + $0x40] sm:$0x33] %v2828_v46  ;;  %1720 = vst [vmem:[#allocation3 + $0x28] sm:$0x33] %v2827_v47  ;;  %1730 = vrot.lane.b32.xlu1 %v1183_v14, %s3210_s26 }
 0x2e4   : > { %1838 = vrot.lane.b32.xlu0 %v1254_v39, %s3219_s4 }
 0x2e5   : > { %1935 = vrot.lane.b32.xlu1 %v1183_v14, %s3217_s28 }
 0x2e8   : > { %1384 = vrot.lane.b32.xlu0 %v1183_v14, %s3218_s3 }
 0x2e9   : > { %1834 = vrot.lane.b32.xlu1 %v1183_v14, %s3219_s4 }
 0x2ec   : > { %1388 = vrot.lane.b32.xlu0 %v1254_v39, %s3218_s3 }
 0x2ed   : > { %2044 = vrot.lane.b32.xlu1 %v1254_v39, %s3216_s23 }
 0x2f0   : > { %1283 = vrot.lane.b32.xlu0 %v1183_v14, %s3220_s14 }
 0x2f1   : > { %1939 = vrot.lane.b32.xlu1 %v1254_v39, %s3217_s28 }
 0x2f4   : > { %1287 = vrot.lane.b32.xlu0 %v1254_v39, %s3220_s14 }
 0x2f5   : > { %1590 = vrot.lane.b32.xlu1 %v1183_v14, %s3212_s21 }
 0x2f8   : > { %1390 = vrot.lane.b32.xlu0 %v1256_v40, %s3218_s3 }
 0x2f9   : > { %1594 = vrot.lane.b32.xlu1 %v1254_v39, %s3212_s21 }
 0x2fc   : > { %1289 = vrot.lane.b32.xlu0 %v1256_v40, %s3220_s14 }
 0x2fd   : > { %1489 = vrot.lane.b32.xlu1 %v1183_v14, %s3221_s12 }
 0x300   : > { %2042 = vrot.lane.b32.xlu0 %v1185_v43, %s3216_s23 }
 0x301   : > { %1596 = vrot.lane.b32.xlu1 %v1256_v40, %s3212_s21 }
 0x304   : > { %2046 = vrot.lane.b32.xlu0 %v1256_v40, %s3216_s23  ;;  %s2565_s23 = scalar_lea.sflag [#allocation7], %s3398_s22 }
 0x305   : > { %1495 = vrot.lane.b32.xlu1 %v1256_v40, %s3221_s12 }
 0x308   : > { %1937 = vrot.lane.b32.xlu0 %v1185_v43, %s3217_s28 }
 0x309   : > { %1732 = vrot.lane.b32.xlu1 %v1185_v43, %s3210_s26 }
 0x30c   : > { %1941 = vrot.lane.b32.xlu0 %v1256_v40, %s3217_s28 }
 0x30d   : > { %1736 = vrot.lane.b32.xlu1 %v1256_v40, %s3210_s26 }
 0x30e   : > { %v3594_v52 = vpop.permute.xlu0 %2036  ;;  %v3596_v53 = vpop.permute.xlu1 %2032 }
 0x310   : > { %1592 = vrot.lane.b32.xlu0 %v1185_v43, %s3212_s21  ;;  %s2692_s21 = sshll.u32 %s3398_s22, 3 }
 0x311   : > { %1836 = vrot.lane.b32.xlu1 %v1185_v43, %s3219_s4  ;;  %s367_s15 = scalar_lea.vmem [#allocation13], %s2692_s21 }
 0x312   : > { %v3600_v54 = vpop.permute.xlu0 %1927  ;;  %v3602_v55 = vpop.permute.xlu1 %1722  ;;  %s2579_s20 = sshll.u32 %s367_s15, 4  ;;  %s2580_s20 = int_to_ptr.vmem [resolvable:$true] %s2579_s20 }
 0x313   : > { %s3125_s28 = scalar_lea.vmem %s2580_s20, 128 }
 0x314   : > { %1491 = vrot.lane.b32.xlu0 %v1185_v43, %s3221_s12  ;;  %p3126_p12 = scmp.ne.s32.totalorder %s2580_s20, %s3125_s28 }
 0x315   : > { %1840 = vrot.lane.b32.xlu1 %v1256_v40, %s3219_s4 }
 0x316   : > { %v3606_v58 = vpop.permute.xlu0 %1931  ;;  %v3608_v59 = vpop.permute.xlu1 %1726  ;;  %p3127_p5 = pnand %p3126_p12, %p4190_p0 }
 0x318   : > { %2157 = vperm.xlu0 %2953, %v2154_v56   ;;  %p3128_p10 = pneg %p3127_p5 }
 0x319   : > { %1386 = vrot.lane.b32.xlu1 %v1185_v43, %s3218_s3  ;;  %s3223_s3 = smov [#allocation13]  }
 0x31a   : > { %v3611_v60 = vpop.permute.xlu0 %1376  ;;  %v3613_v61 = vpop.permute.xlu1 %1826  ;;  %s3129_s4 = sshll.u32 %s3223_s3, 4  ;;  %s3130_s4 = int_to_ptr.vmem [resolvable:$false] %s3129_s4 }
 0x31b   : > { %s3131_s6 = scalar_lea.vmem %s3130_s4, 256  ;;  %p3132_p1 = scmp.lt.s32.totalorder %s2580_s20, %s3130_s4 }
 0x31c   : > { %p3133_p2 = scmp.lt.s32.totalorder %s3131_s6, %s3125_s28 }
 0x31d   : > { %1285 = vrot.lane.b32.xlu1 %v1185_v43, %s3220_s14  ;;  %v1412_v43 = vrot.slane %v3670_v38, %v3514_v42 }
 0x31e   : > { %v3616_v62 = vpop.permute.xlu0 %1275  ;;  %v3618_v63 = vpop.permute.xlu1 %1830  ;;  %p3134_p3 = por %p3133_p2, %p3132_p1 }
 0x320   : > { %p3135_p9 = pnand %p3134_p3, %p3128_p10 }
 0x321   : > { %1493 = vrot.lane.b32.xlu1 %v1254_v39, %s3221_s12 }
 0x322   : > { %v3621_v0 = vpop.permute.xlu0 %1380  ;;  %v3623_v4 = vpop.permute.xlu1 %1582 }
 0x326   : > { %v3625_v5 = vpop.permute.xlu0 %1586  ;;  %v3627_v6 = vpop.permute.xlu1 %1481 }
 0x32a   : > { %v3634_v11 = vpop.permute.xlu0 %1279  ;;  %v2035_v12 = vpop.permute.xlu1 %2034 }
 0x32b   : > { %v2054_v13 = vsel %vm2048_vm12, %v2035_v12, %v3594_v52  ;;  %v2055_v49 = vsel %vm2048_vm12, %v3596_v53, %v2035_v12 }
 0x32c   : > { %v2089_v51 = vmul.f32 %v2750_v7, %v2055_v49  ;;  %v2090_v15 = vmul.f32 %v2751_v8, %v2054_v13  ;;  %v1416_v13 = vrot.slane %v3674_v1, %v3514_v42 }
 0x32e   : > { %v2841_v18 = vpack.c.bf16 %v2090_v15, %v2089_v51  ;;  %v3647_v19 = vpop.permute.xlu0 %1485  ;;  %v1930_v20 = vpop.permute.xlu1 %1929 }
 0x32f   : > { %v1949_v21 = vsel %vm1943_vm13, %v1930_v20, %v3606_v58  ;;  %v1950_v22 = vsel %vm1943_vm13, %v3600_v54, %v1930_v20 }
 0x330   : > { %2129 = vst [vmem:[#allocation3 + $0x20] sm:$0x33] %v2841_v18  ;;  %v1984_v23 = vmul.f32 %v1955_v16, %v1950_v22  ;;  %v1985_v24 = vmul.f32 %v1959_v17, %v1949_v21 }
 0x332   : > { %v2837_v29 = vpack.c.bf16 %v1985_v24, %v1984_v23  ;;  %v1725_v30 = vpop.permute.xlu0 %1724  ;;  %v3659_v31 = vpop.permute.xlu1 %1378  ;;  %v1617_v23 = vrot.slane %v3670_v38, %v3492_v28 }
 0x333   : > { %v1743_v32 = vsel %vm494_vm4, %v1725_v30, %v3608_v59  ;;  %v1744_v33 = vsel %vm494_vm4, %v3602_v55, %v1725_v30  ;;  %v1398_v49 = vsel %vm1392_vm15, %v3659_v31, %v3621_v0 }
 0x334   : > { %v2020_v35 = vrot.slane %v2837_v29, 6  ;;  %v1778_v36 = vmul.f32 %v1749_v26, %v1744_v33  ;;  %v1779_v37 = vmul.f32 %v1753_v27, %v1743_v32  ;;  %v1435_v22 = vmul.f32 %v1412_v43, %v1398_v49 }
 0x335   : > { %v1621_v26 = vrot.slane %v3674_v1, %v3492_v28  ;;  %v1311_v32 = vrot.slane %v3670_v38, %v3511_v41 }
 0x336   : > { %2028 = vst [vmem:[#allocation3 + $0x58] sm:$0xcc] %v2020_v35  ;;  %v2829_v14 = vpack.c.bf16 %v1779_v37, %v1778_v36  ;;  %v1829_v39 = vpop.permute.xlu0 %1828  ;;  %v3677_v40 = vpop.permute.xlu1 %1277  ;;  %v1315_v37 = vrot.slane %v3674_v1, %v3511_v41 }
 0x337   : > { %v1848_v46 = vsel %vm1842_vm14, %v1829_v39, %v3618_v63  ;;  %v1849_v47 = vsel %vm1842_vm14, %v3613_v61, %v1829_v39  ;;  %v2150_v56 = vld [vmem:[#allocation3 + $0x20] sm:$0x33] }
 0x338   : > { %v1814_v7 = vrot.slane %v2829_v14, 6  ;;  %v1883_v8 = vmul.f32 %v1854_v34, %v1849_v47  ;;  %v1884_v12 = vmul.f32 %v1858_v2, %v1848_v46  ;;  %v2779_v51 = vcombine.high %v2150_v56, %v2150_v56 }
 0x339   : > { %v2778_v15 = vcombine.low %v2150_v56, %v2150_v56  ;;  %v1297_v2 = vsel %vm1291_vm1, %v3677_v40, %v3634_v11 }
 0x33a   : > { %1822 = vst [vmem:[#allocation3 + $0x8] sm:$0xcc] %v1814_v7  ;;  %v2833_v16 = vpack.c.bf16 %v1884_v12, %v1883_v8  ;;  %v3693_v17 = vpop.permute.xlu0 %1584  ;;  %v3695_v18 = vpop.permute.xlu1 %1382  ;;  %2786 = vmatprep.subr.msk.bf16.mxu1 %vm2268_vm0, %v2779_v51  ;;  %v1334_v7 = vmul.f32 %v1311_v32, %v1297_v2 }
 0x33b   : > { %v1397_v20 = vsel %vm1392_vm15, %v3621_v0, %v3695_v18  ;;  %v2270_v21 = vsel %vm2268_vm0, %v2778_v15, 0  ;;  %v1603_v27 = vsel %vm459_vm6, %v3693_v17, %v3625_v5 }
 0x33c   : > { %1923 = vst [vmem:[#allocation3 + $0x58] sm:$0x33] %v2833_v16  ;;  %v1436_v24 = vmul.f32 %v1416_v13, %v1397_v20  ;;  %2304 = vmatpush1.bf16.msra.mxu1 %v2270_v21  ;;  %v1640_v34 = vmul.f32 %v1617_v23, %v1603_v27  ;;  %v1521_v13 = vrot.slane %v3674_v1, %v3489_v25  ;;  %v2753_v27 = vld [vmem:[#allocation11 + $0x58] ss:$0 sm:$0xff] }
 0x33e   : > { %v2814_v0 = vpack.c.bf16 %v1436_v24, %v1435_v22  ;;  %v3712_v29 = vpop.permute.xlu0 %1483  ;;  %v3714_v30 = vpop.permute.xlu1 %1588  ;;  %v2752_v24 = vld [vmem:[#allocation11 + $0x50] ss:$0 sm:$0xff] }
 0x33f   : > { %v1602_v33 = vsel %vm459_vm6, %v3625_v5, %v3714_v30  ;;  %v1517_v5 = vrot.slane %v3670_v38, %v3489_v25  ;;  %v1503_v49 = vsel %vm1497_vm2, %v3712_v29, %v3647_v19 }
 0x340   : > { %v1470_v35 = vrot.slane %v2814_v0, 6  ;;  %v1641_v36 = vmul.f32 %v1621_v26, %v1602_v33 }
 0x341   : > { %v1540_v20 = vmul.f32 %v1517_v5, %v1503_v49 }
 0x342   : > { %1478 = vst [vmem:[#allocation3 + $0x38] sm:$0xcc] %v1470_v35  ;;  %v2822_v14 = vpack.c.bf16 %v1641_v36, %v1640_v34  ;;  %v2039_v39 = vpop.permute.xlu0 %2038  ;;  %v3729_v43 = vpop.permute.xlu1 %1281  ;;  %v1757_v34 = vrot.slane %v3670_v38, %v3463_v57  ;;  %v1761_v36 = vrot.slane %v3674_v1, %v3463_v57 }
 0x343   : > { %v1296_v46 = vsel %vm1291_vm1, %v3634_v11, %v3729_v43  ;;  %v2956_v47 = vld [vmem:[#allocation3 + $0x8] ss:$80 sps:$4 sm:$0xff]   ;;  %v2958_v56 = vld [vmem:[#allocation3 + $0xc] ss:$80 sps:$4 sm:$0xff]   ;;  %v2053_v26 = vsel %vm2048_vm12, %v3594_v52, %v2039_v39 }
 0x344   : > { %v1675_v8 = vrot.slane %v2822_v14, 6  ;;  %v1335_v12 = vmul.f32 %v1315_v37, %v1296_v46  ;;  %2305 = vmatprep.subr.bf16.mxu1 %v2958_v56  ;;  %v1963_v46 = vrot.slane %v3670_v38, %v3453_v50  ;;  %v1967_v56 = vrot.slane %v3674_v1, %v3453_v50 }
 0x345   : > { %2306 = vmatpush1.bf16.msra.mxu1 %v2956_v47 }
 0x346   : > { %1683 = vst [vmem:[#allocation3 + $0x68] sm:$0xcc] %v1675_v8  ;;  %v2810_v51 = vpack.c.bf16 %v1335_v12, %v1334_v7  ;;  %v1729_v15 = vpop.permute.xlu0 %1728  ;;  %v3743_v16 = vpop.permute.xlu1 %1487 }
 0x347   : > { %v1502_v11 = vsel %vm1497_vm2, %v3647_v19, %v3743_v16  ;;  %v2091_v19 = vmul.f32 %v2752_v24, %v2053_v26  ;;  %v1742_v52 = vsel %vm494_vm4, %v3608_v59, %v1729_v15 }
 0x348   : > { %1373 = vst [vmem:[#allocation3 + $0x38] sm:$0x33] %v2810_v51  ;;  %v1541_v21 = vmul.f32 %v1521_v13, %v1502_v11  ;;  %v1780_v5 = vmul.f32 %v1757_v34, %v1742_v52  ;;  %v1862_v13 = vrot.slane %v3670_v38, %v3448_v48  ;;  %v1404_v52 = vrot.slane %v3630_v9, %v3514_v42 }
 0x34a   : > { %v2818_v22 = vpack.c.bf16 %v1541_v21, %v1540_v20  ;;  %v1934_v23 = vpop.permute.xlu0 %1933  ;;  %v1866_v20 = vrot.slane %v3674_v1, %v3448_v48 }
 0x34b   : > { %v1948_v59 = vsel %vm1943_vm13, %v3606_v58, %v1934_v23 }
 0x34c   : > { %1579 = vst [vmem:[#allocation3 + $0x68] sm:$0x33] %v2818_v22  ;;  %v1986_v51 = vmul.f32 %v1963_v46, %v1948_v59  ;;  %v3829_v59 = vld [vmem:[#allocation11 + $0x20] sm:$0xff] }
 0x34e   : > { %v1833_v0 = vpop.permute.xlu0 %1832 }
 0x34f   : > { %v3752_v32 = vpop.permute.xlu1 %2040  ;;  %v1847_v58 = vsel %vm1842_vm14, %v3618_v63, %v1833_v0 }
 0x350   : > { %v2052_v33 = vsel %vm2048_vm12, %v2039_v39, %v3752_v32 }
 0x351   : > { %v2092_v35 = vmul.f32 %v2753_v27, %v2052_v33 }
 0x352   : > { %v3764_v37 = vpop.permute.xlu0 %1734 }
 0x353   : > { %v2842_v2 = vpack.c.bf16 %v2092_v35, %v2091_v19  ;;  %v3766_v14 = vpop.permute.xlu1 %1730 }
 0x354   : > { %v1741_v39 = vsel %vm494_vm4, %v1729_v15, %v3766_v14 }
 0x355   : > { %2130 = vst [vmem:[#allocation3 + $0x48] sm:$0x33] %v2842_v2  ;;  %v1781_v47 = vmul.f32 %v1761_v36, %v1741_v39  ;;  %v1399_v2 = vsel %vm1392_vm15, %v3611_v60, %v3659_v31  ;;  %v1298_v31 = vsel %vm1291_vm1, %v3616_v62, %v3677_v40 }
 0x356   : > { %v3778_v7 = vpop.permute.xlu0 %1838 }
 0x357   : > { %v2830_v8 = vpack.c.bf16 %v1781_v47, %v1780_v5  ;;  %v3780_v12 = vpop.permute.xlu1 %1935 }
 0x358   : > { %v1947_v49 = vsel %vm1943_vm13, %v1934_v23, %v3780_v12  ;;  %v1885_v23 = vmul.f32 %v1862_v13, %v1847_v58  ;;  %v1303_v13 = vrot.slane %v3630_v9, %v3511_v41 }
 0x359   : > { %v1815_v15 = vrot.slane %v2830_v8, 6  ;;  %v1987_v11 = vmul.f32 %v1967_v56, %v1947_v49  ;;  %v1307_v56 = vrot.slane %v3632_v10, %v3511_v41  ;;  %v1613_v49 = vrot.slane %v3632_v10, %v3492_v28 }
 0x35a   : > { %v3792_v21 = vpop.permute.xlu0 %1384 }
 0x35b   : > { %1823 = vst [vmem:[#allocation3 + $0x88] sm:$0xcc] %v1815_v15  ;;  %v2838_v22 = vpack.c.bf16 %v1987_v11, %v1986_v51  ;;  %v3794_v24 = vpop.permute.xlu1 %1834  ;;  %v3839_v51 = vld [vmem:[#allocation11 + $0x38] sm:$0xff]  ;;  %v1513_v11 = vrot.slane %v3632_v10, %v3489_v25 }
 0x35c   : > { %v1846_v38 = vsel %vm1842_vm14, %v1833_v0, %v3794_v24  ;;  %v1408_v0 = vrot.slane %v3632_v10, %v3514_v42  ;;  %v3857_v10 = vld [vmem:[#allocation11 + $0x28] sm:$0xff] }
 0x35d   : > { %v2021_v26 = vrot.slane %v2838_v22, 6  ;;  %v1886_v27 = vmul.f32 %v1866_v20, %v1846_v38  ;;  %v1333_v38 = vmul.f32 %v1307_v56, %v1298_v31  ;;  %v1765_v31 = vrot.slane %v3829_v59, %v3463_v57 }
 0x35e   : > { %v3799_v33 = vpop.permute.xlu0 %1388  ;;  %v1434_v47 = vmul.f32 %v1408_v0, %v1399_v2  ;;  %v2754_v2 = vld [vmem:[#allocation11 + $0x60] ss:$0 sm:$0xff]  ;;  %v1975_v20 = vrot.slane %v3857_v10, %v3453_v50 }
 0x35f   : > { %2029 = vst [vmem:[#allocation3 + $0x10] sm:$0xcc] %v2021_v26  ;;  %v2834_v1 = vpack.c.bf16 %v1886_v27, %v1885_v23  ;;  %v3801_v19 = vpop.permute.xlu1 %2044 }
 0x361   : > { %1924 = vst [vmem:[#allocation3 + $0x10] sm:$0x33] %v2834_v1 }
 0x362   : > { %v3803_v63 = vpop.permute.xlu0 %1283 }
 0x363   : > { %v3805_v34 = vpop.permute.xlu1 %1939 }
 0x366   : > { %v3807_v35 = vpop.permute.xlu0 %1287 }
 0x367   : > { %v3809_v36 = vpop.permute.xlu1 %1590 }
 0x36a   : > { %v3819_v39 = vpop.permute.xlu0 %1390 }
 0x36b   : > { %v3821_v5 = vpop.permute.xlu1 %1594  ;;  %v1400_v46 = vsel %vm1392_vm15, %v3819_v39, %v3611_v60 }
 0x36c   : > { %v1433_v8 = vmul.f32 %v1404_v52, %v1400_v46  ;;  %v1609_v52 = vrot.slane %v3630_v9, %v3492_v28  ;;  %v2755_v46 = vld [vmem:[#allocation11 + $0x68] ss:$0 sm:$0xff] }
 0x36e   : > { %v2813_v60 = vpack.c.bf16 %v1434_v47, %v1433_v8  ;;  %v3841_v15 = vpop.permute.xlu0 %1289  ;;  %v1604_v47 = vsel %vm459_vm6, %v3623_v4, %v3693_v17 }
 0x36f   : > { %v3849_v22 = vpop.permute.xlu1 %1489  ;;  %v1299_v40 = vsel %vm1291_vm1, %v3841_v15, %v3616_v62  ;;  %v1639_v3 = vmul.f32 %v1613_v49, %v1604_v47  ;;  %v1983_v49 = vrot.slane %v3839_v51, %v3453_v50 }
 0x370   : > { %v1469_v26 = vrot.slane %v2813_v60, 6  ;;  %v1332_v27 = vmul.f32 %v1303_v13, %v1299_v40  ;;  %v1509_v13 = vrot.slane %v3630_v9, %v3489_v25  ;;  %v3875_v60 = vld [vmem:[#allocation11 + $0x30] sm:$0xff]  ;;  %v1971_v9 = vrot.slane %v3829_v59, %v3453_v50 }
 0x371   : > { %v1773_v62 = vrot.slane %v3875_v60, %v3463_v57 }
 0x372   : > { %1477 = vst [vmem:[#allocation3] sm:$0xcc] %v1469_v26  ;;  %v2809_v56 = vpack.c.bf16 %v1333_v38, %v1332_v27  ;;  %v2043_v8 = vpop.permute.xlu0 %2042  ;;  %v1769_v38 = vrot.slane %v3857_v10, %v3463_v57 }
 0x373   : > { %v3877_v40 = vpop.permute.xlu1 %1596  ;;  %v2050_v58 = vsel %vm2048_vm12, %v2043_v8, %v3801_v19  ;;  %v2051_v17 = vsel %vm2048_vm12, %v3752_v32, %v2043_v8  ;;  %v2756_v32 = vld [vmem:[#allocation11 + $0x70] ss:$0 sm:$0xff]  ;;  %v2757_v8 = vld [vmem:[#allocation11 + $0x78] ss:$0 sm:$0xff] }
 0x374   : > { %1372 = vst [vmem:[#allocation3] sm:$0x33] %v2809_v56  ;;  %v1605_v26 = vsel %vm459_vm6, %v3877_v40, %v3623_v4  ;;  %v2093_v27 = vmul.f32 %v2754_v2, %v2051_v17  ;;  %v2094_v1 = vmul.f32 %v2755_v46, %v2050_v58  ;;  %v1777_v56 = vrot.slane %v3839_v51, %v3463_v57 }
 0x375   : > { %v1638_v0 = vmul.f32 %v1609_v52, %v1605_v26  ;;  %v1504_v4 = vsel %vm1497_vm2, %v3627_v6, %v3712_v29  ;;  %v1979_v46 = vrot.slane %v3875_v60, %v3453_v50  ;;  %v1878_v29 = vrot.slane %v3875_v60, %v3448_v48 }
 0x376   : > { %v2843_v2 = vpack.c.bf16 %v2094_v1, %v2093_v27  ;;  %v2047_v58 = vpop.permute.xlu0 %2046  ;;  %v1539_v26 = vmul.f32 %v1513_v11, %v1504_v4  ;;  %v1529_v4 = vrot.slane %v3857_v10, %v3489_v25 }
 0x377   : > { %v2821_v52 = vpack.c.bf16 %v1639_v3, %v1638_v0  ;;  %v3907_v47 = vpop.permute.xlu1 %1495  ;;  %v2049_v57 = vsel %vm2048_vm12, %v3801_v19, %v2047_v58  ;;  %v2056_v17 = vsel %vm2048_vm12, %v2047_v58, %v3596_v53  ;;  %v1874_v0 = vrot.slane %v3857_v10, %v3448_v48 }
 0x378   : > { %2131 = vst [vmem:[#allocation3 + $0x70] sm:$0x33] %v2843_v2  ;;  %v1505_v50 = vsel %vm1497_vm2, %v3907_v47, %v3627_v6  ;;  %v2095_v3 = vmul.f32 %v2756_v32, %v2049_v57  ;;  %v2096_v1 = vmul.f32 %v2757_v8, %v2056_v17  ;;  %v1629_v53 = vrot.slane %v3857_v10, %v3492_v28 }
 0x379   : > { %v1674_v19 = vrot.slane %v2821_v52, 6  ;;  %v1538_v27 = vmul.f32 %v1509_v13, %v1505_v50  ;;  %v1633_v2 = vrot.slane %v3875_v60, %v3492_v28  ;;  %v1882_v6 = vrot.slane %v3839_v51, %v3448_v48  ;;  %v3939_v52 = vld [vmem:[#allocation3 + $0x48] sm:$0x33] }
 0x37a   : > { %v2844_v58 = vpack.c.bf16 %v2096_v1, %v2095_v3  ;;  %v1938_v23 = vpop.permute.xlu0 %1937 }
 0x37b   : > { %1682 = vst [vmem:[#allocation3 + $0x30] sm:$0xcc] %v1674_v19  ;;  %v2817_v32 = vpack.c.bf16 %v1539_v26, %v1538_v27  ;;  %v1733_v8 = vpop.permute.xlu1 %1732  ;;  %v1945_v11 = vsel %vm1943_vm13, %v1938_v23, %v3805_v34  ;;  %v1946_v13 = vsel %vm1943_vm13, %v3780_v12, %v1938_v23  ;;  %v1601_v19 = vsel %vm459_vm6, %v3714_v30, %v3809_v36 }
 0x37c   : > { %2132 = vst [vmem:[#allocation3 + $0x90] sm:$0x33] %v2844_v58  ;;  %v1739_v57 = vsel %vm494_vm4, %v1733_v8, %v3764_v37  ;;  %v1740_v17 = vsel %vm494_vm4, %v3766_v14, %v1733_v8  ;;  %v1988_v50 = vmul.f32 %v1971_v9, %v1946_v13  ;;  %v1989_v3 = vmul.f32 %v1975_v20, %v1945_v11 }
 0x37d   : > { %1578 = vst [vmem:[#allocation3 + $0x30] sm:$0x33] %v2817_v32  ;;  %v1782_v1 = vmul.f32 %v1765_v31, %v1740_v17  ;;  %v1783_v26 = vmul.f32 %v1769_v38, %v1739_v57  ;;  %v2781_v14 = vcombine.high %v3939_v52, %v3939_v52  ;;  %v2780_v20 = vcombine.low %v3939_v52, %v3939_v52 }
 0x37e   : > { %v2839_v27 = vpack.c.bf16 %v1989_v3, %v1988_v50  ;;  %v1942_v58 = vpop.permute.xlu0 %1941  ;;  %v1598_v31 = vsel %vm459_vm6, %v3821_v5, %v3877_v40  ;;  %v1295_v52 = vsel %vm1291_vm1, %v3729_v43, %v3803_v63  ;;  %v4187_v43 = vrot.slane %v3857_v10, %v3514_v42 }
 0x37f   : > { %v2831_v38 = vpack.c.bf16 %v1783_v26, %v1782_v1  ;;  %v1737_v9 = vpop.permute.xlu1 %1736  ;;  %v1944_v32 = vsel %vm1943_vm13, %v3805_v34, %v1942_v58  ;;  %v1951_v30 = vsel %vm1943_vm13, %v1942_v58, %v3600_v54  ;;  %v2152_v8 = vld [vmem:[#allocation3 + $0x70] sm:$0x33]  ;;  %v4180_v34 = vrot.slane %v3829_v59, %v3492_v28 }
 0x380   : > { %v2022_v11 = vrot.slane %v2839_v27, 6  ;;  %v1738_v13 = vsel %vm494_vm4, %v3764_v37, %v1737_v9  ;;  %v1745_v40 = vsel %vm494_vm4, %v1737_v9, %v3602_v55  ;;  %v1990_v57 = vmul.f32 %v1979_v46, %v1944_v32 }
 0x381   : > { %v1816_v17 = vrot.slane %v2831_v38, 6  ;;  %v1784_v50 = vmul.f32 %v1773_v62, %v1738_v13  ;;  %v1785_v3 = vmul.f32 %v1777_v56, %v1745_v40  ;;  %v1991_v1 = vmul.f32 %v1983_v49, %v1951_v30 }
 0x382   : > { %v1642_v26 = vmul.f32 %v4180_v34, %v1601_v19  ;;  %v4181_v54 = vrot.slane %v3839_v51, %v3492_v28  ;;  %2030 = vst [vmem:[#allocation3 + $0x98] sm:$0xcc] %v2022_v11  ;;  %v2783_v58 = vcombine.high %v2152_v8, %v2152_v8  ;;  %v1593_v37 = vpop.permute.xlu0 %1592  ;;  %v2782_v23 = vcombine.low %v2152_v8, %v2152_v8 }
 0x383   : > { %1824 = vst [vmem:[#allocation3 + $0x28] sm:$0xcc] %v1816_v17  ;;  %v2832_v12 = vpack.c.bf16 %v1785_v3, %v1784_v50  ;;  %v2840_v55 = vpack.c.bf16 %v1991_v1, %v1990_v57  ;;  %v1837_v46 = vpop.permute.xlu1 %1836  ;;  %v1599_v62 = vsel %vm459_vm6, %v1593_v37, %v3821_v5  ;;  %v1600_v56 = vsel %vm459_vm6, %v3809_v36, %v1593_v37 }
 0x384   : > { %v1645_v27 = vmul.f32 %v4181_v54, %v1598_v31  ;;  %v1844_v28 = vsel %vm1842_vm14, %v1837_v46, %v3778_v7  ;;  %v1845_v49 = vsel %vm1842_vm14, %v3794_v24, %v1837_v46  ;;  %2790 = vmatprep.subr.msk.bf16.mxu0 %vm2268_vm0, %v2783_v58  ;;  %v1643_v19 = vmul.f32 %v1629_v53, %v1600_v56  ;;  %v2961_v38 = vld [vmem:[#allocation3] ss:$48 sps:$4 sm:$0xff]   ;;  %v2963_v9 = vld [vmem:[#allocation3 + $0x4] ss:$48 sps:$4 sm:$0xff]  }
 0x385   : > { %v1644_v31 = vmul.f32 %v1633_v2, %v1599_v62  ;;  %v1817_v32 = vrot.slane %v2832_v12, 6  ;;  %v2023_v5 = vrot.slane %v2840_v55, 6  ;;  %v4182_v30 = vrot.slane %v3829_v59, %v3448_v48  ;;  %2307 = vmatprep.subr.bf16.mxu1 %v2963_v9 }
 0x386   : > { %v1888_v8 = vmul.f32 %v1874_v0, %v1844_v28  ;;  %v1501_v24 = vsel %vm1497_vm2, %v3743_v16, %v3849_v22  ;;  %v2823_v11 = vpack.c.bf16 %v1643_v19, %v1642_v26  ;;  %v2282_v2 = vsel %vm2268_vm0, %v2782_v23, 0  ;;  %v4005_v12 = vpop.permute.xlu0 %1491  ;;  %2308 = vmatpush1.bf16.msra.mxu1 %v2961_v38  ;;  %v4018_v23 = vld [vmem:[%s4153_s5] sm:$0x1]  ;;  %v2971_v19 = vld [vmem:[#allocation3 + $0x3c] ss:$48 sps:$4 sm:$0xff]  }
 0x387   : > { %v1887_v36 = vmul.f32 %v4182_v30, %v1845_v49  ;;  %v2824_v53 = vpack.c.bf16 %v1645_v27, %v1644_v31  ;;  %v1396_v13 = vsel %vm1392_vm15, %v3695_v18, %v3792_v21  ;;  %1825 = vst [vmem:[#allocation3 + $0x40] sm:$0xcc] %v1817_v32  ;;  %2031 = vst [vmem:[#allocation3 + $0x60] sm:$0xcc] %v2023_v5  ;;  %2386 = vmatpush1.bf16.msra.mxu0 %v2282_v2  ;;  %v1841_v40 = vpop.permute.xlu1 %1840  ;;  %v4184_v27 = vmov 0  }
 0x388   : > { %v1500_v16 = vsel %vm1497_vm2, %v3849_v22, %v4005_v12  ;;  %v1676_v57 = vrot.slane %v2823_v11, 6  ;;  %v1843_v18 = vsel %vm1842_vm14, %v3778_v7, %v1841_v40  ;;  %v1850_v50 = vsel %vm1842_vm14, %v1841_v40, %v3613_v61  ;;  %2788 = vmatprep.subr.msk.bf16.mxu1 %vm2268_vm0, %v2781_v14  ;;  %v2966_v49 = vld [vmem:[#allocation3 + $0x88] ss:$-120 sps:$4 sm:$0xff]  }
 0x389   : > { %v2835_v0 = vpack.c.bf16 %v1888_v8, %v1887_v36  ;;  %v1677_v17 = vrot.slane %v2824_v53, 6  ;;  %v4183_v22 = vrot.slane %v3829_v59, %v3489_v25  ;;  %v1889_v1 = vmul.f32 %v1878_v29, %v1843_v18  ;;  %2787 = vmatmul.mubr.msk.bf16.vlgmr.msra.gmra.mxu1 %vm2264_vm3, %v4018_v23  ;;  %v2968_v29 = vld [vmem:[#allocation3 + $0x8c] ss:$-120 sps:$4 sm:$0xff]   ;;  %v2969_v2 = vld [vmem:[#allocation3 + $0x38] ss:$48 sps:$4 sm:$0xff]  }
 0x38a   : > { %v1890_v34 = vmul.f32 %v1882_v6, %v1850_v50  ;;  %v1543_v7 = vmul.f32 %v1529_v4, %v1500_v16  ;;  %v1393_v61 = vsel %vm1392_vm15, %v3799_v33, %v3819_v39  ;;  %v1331_v14 = vrot.slane %v3839_v51, %v3511_v41  ;;  %1684 = vst [vmem:[#allocation3 + $0x78] sm:$0xcc] %v1676_v57  ;;  %v2153_v5 = vld [vmem:[#allocation3 + $0x90] sm:$0x33] }
 0x38b   : > { %v1542_v3 = vmul.f32 %v4183_v22, %v1501_v24  ;;  %1925 = vst [vmem:[#allocation3 + $0x98] sm:$0x33] %v2835_v0  ;;  %1685 = vst [vmem:[#allocation3 + $0x80] sm:$0xcc] %v1677_v17  ;;  %v2276_v48 = vsel %vm2268_vm0, %v2780_v20, 0  ;;  %v1323_v6 = vrot.slane %v3857_v10, %v3511_v41  ;;  %v1387_v39 = vpop.permute.xlu1 %1386  ;;  %v1327_v54 = vrot.slane %v3875_v60, %v3511_v41 }
 0x38c   : > { %v2836_v4 = vpack.c.bf16 %v1890_v34, %v1889_v1  ;;  %2345 = vmatpush1.bf16.msra.mxu1 %v2276_v48  ;;  %2366 = vmatprep.mubr.bf16.mxu1 %v4184_v27  ;;  %v4185_v58 = vrot.slane %v3829_v59, %v3514_v42  ;;  %v1394_v20 = vsel %vm1392_vm15, %v1387_v39, %v3799_v33 }
 0x38d   : > { %v2819_v26 = vpack.c.bf16 %v1543_v7, %v1542_v3  ;;  %v1395_v55 = vsel %vm1392_vm15, %v3792_v21, %v1387_v39  ;;  %2346 = vmatprep.subr.bf16.mxu1 %v2968_v29  ;;  %v4186_v46 = vrot.slane %v3839_v51, %v3514_v42  ;;  %v1292_v56 = vsel %vm1291_vm1, %v3807_v35, %v3841_v15 }
 0x38e   : > { %v1437_v37 = vmul.f32 %v4185_v58, %v1396_v13  ;;  %1926 = vst [vmem:[#allocation3 + $0x60] sm:$0x33] %v2836_v4  ;;  %v1438_v33 = vmul.f32 %v4187_v43, %v1395_v55  ;;  %v4188_v28 = vrot.slane %v3875_v60, %v3514_v42  ;;  %v1533_v32 = vrot.slane %v3875_v60, %v3489_v25  ;;  %v2145_v57 = vld [vmem:[#allocation3 + $0x40] sm:$0xff] }
 0x38f   : > { %v1440_v62 = vmul.f32 %v4186_v46, %v1393_v61  ;;  %1580 = vst [vmem:[#allocation3 + $0x78] sm:$0x33] %v2819_v26  ;;  %v1286_v9 = vpop.permute.xlu1 %1285  ;;  %v1537_v15 = vrot.slane %v3839_v51, %v3489_v25  ;;  %v4189_v10 = vrot.slane %v3829_v59, %v3511_v41  ;;  %v1339_v36 = vmul.f32 %v1331_v14, %v1292_v56 }
 0x390   : > { %v1439_v21 = vmul.f32 %v4188_v28, %v1394_v20  ;;  %v2815_v31 = vpack.c.bf16 %v1438_v33, %v1437_v37  ;;  %2347 = vmatpush1.bf16.msra.mxu1 %v2966_v49  ;;  %v1293_v42 = vsel %vm1291_vm1, %v1286_v9, %v3807_v35  ;;  %v1294_v8 = vsel %vm1291_vm1, %v3803_v63, %v1286_v9 }
 0x391   : > { %v1336_v30 = vmul.f32 %v4189_v10, %v1295_v52  ;;  %2348 = vmatprep.subr.bf16.mxu1 %v2971_v19  ;;  %v1337_v25 = vmul.f32 %v1323_v6, %v1294_v8  ;;  %v1338_v51 = vmul.f32 %v1327_v54, %v1293_v42  ;;  %v2785_v59 = vcombine.high %v2153_v5, %v2153_v5 }
 0x392   : > { %v2816_v38 = vpack.c.bf16 %v1440_v62, %v1439_v21  ;;  %v2972_v24 = vld [vmem:[#allocation3 + $0x28] ss:$112 sps:$4 sm:$0xff]   ;;  %v2974_v60 = vld [vmem:[#allocation3 + $0x2c] ss:$112 sps:$4 sm:$0xff]   ;;  %v1471_v11 = vrot.slane %v2815_v31, 6  ;;  %v2784_v13 = vcombine.low %v2153_v5, %v2153_v5 }
 0x393   : > { %2387 = vmatprep.subr.bf16.mxu0 %v2974_v60  ;;  %v2811_v0 = vpack.c.bf16 %v1337_v25, %v1336_v30  ;;  %v2812_v40 = vpack.c.bf16 %v1339_v36, %v1338_v51  ;;  %v1494_v35 = vpop.permute.xlu1 %1493  ;;  %v2158_v6 = vpop.permute.xlu0 %2157 }
 0x394   : > { %v1472_v53 = vrot.slane %v2816_v38, 6  ;;  %1479 = vst [vmem:[#allocation3 + $0x50] sm:$0xcc] %v1471_v11  ;;  %2349 = vmatpush1.bf16.msra.mxu1 %v2969_v2  ;;  %2388 = vmatpush1.bf16.msra.mxu0 %v2972_v24  ;;  %v1498_v63 = vsel %vm1497_vm2, %v1494_v35, %v3907_v47  ;;  %v1499_v16 = vsel %vm1497_vm2, %v4005_v12, %v1494_v35  ;;  %v2288_v3 = vsel %vm2268_vm0, %v2784_v13, 0 }
 0x395   : > { %2792 = vmatprep.subr.msk.bf16.mxu1 %vm2268_vm0, %v2785_v59  ;;  %v2149_v17 = vld [vmem:[#allocation3 + $0x60] sm:$0xff]  ;;  %1374 = vst [vmem:[#allocation3 + $0x50] sm:$0x33] %v2811_v0  ;;  %1375 = vst [vmem:[#allocation3 + $0x18] sm:$0x33] %v2812_v40  ;;  %v1544_v18 = vmul.f32 %v1533_v32, %v1499_v16  ;;  %v1545_v50 = vmul.f32 %v1537_v15, %v1498_v63  ;;  %v2163_v26 = vrot.slane %v2158_v6, %v3511_v41 }
 0x396   : > { %1480 = vst [vmem:[#allocation3 + $0x18] sm:$0xcc] %v1472_v53  ;;  %v2777_v22 = vcombine.high %v2145_v57, %v2149_v17  ;;  %v2776_v45 = vcombine.low %v2145_v57, %v2149_v17 }
 0x397   : > { %2789 = vmatmul.mubr.msk.bf16.vlgmr.msra.gmra.mxu1 %vm2264_vm3, %v4018_v23  ;;  %v2820_v1 = vpack.c.bf16 %v1545_v50, %v1544_v18 }
 0x398   : > { %2427 = vmatpush1.bf16.msra.mxu1 %v2288_v3  ;;  %2448 = vmatprep.mubr.bf16.mxu1 %v4184_v27 }
 0x399   : > { %2428 = vmatprep.subr.bf16.mxu1 %v2777_v22  ;;  %1581 = vst [vmem:[#allocation3 + $0x80] sm:$0x33] %v2820_v1 }
 0x39c   : > { %2429 = vmatpush1.bf16.msra.mxu1 %v2776_v45  ;;  %v2977_v47 = vld [vmem:[#allocation3 + $0x50] ss:$40 sps:$4 sm:$0xff]   ;;  %v2979_v12 = vld [vmem:[#allocation3 + $0x54] ss:$40 sps:$4 sm:$0xff]   ;;  %v3222_v45 = vmov 1966171168  }
 0x39d   : > { %2389 = vmatprep.subr.bf16.mxu0 %v2979_v12 }
 0x39e   : > { %2390 = vmatpush1.bf16.msra.mxu0 %v2977_v47  ;;  %v2518_v47 = vunpack.c.l.s4 %v3222_v45 }
 0x3a0   : > { %v2980_v34 = vld [vmem:[#allocation3 + $0x18] ss:$104 sps:$4 sm:$0xff]   ;;  %v2982_v7 = vld [vmem:[#allocation3 + $0x1c] ss:$104 sps:$4 sm:$0xff]  }
 0x3a1   : > { %2791 = vmatmul.mubr.msk.bf16.vlgmr.msra.gmra.mxu0 %vm2264_vm3, %v4018_v23  ;;  %2430 = vmatprep.subr.bf16.mxu1 %v2982_v7  ;;  %v2519_v7 = vunpack.c.0.s8 %v2518_v47 }
 0x3a2   : > { %2431 = vmatpush1.bf16.msra.mxu1 %v2980_v34 }
 0x3a5   : > { %2793 = vmatmul.mubr.msk.bf16.vlgmr.msra.gmra.mxu1 %vm2264_vm3, %v4018_v23 }
 0x449   : > { %v2327_v61 = vpop.f32.mrf.mxu1 }
 0x44a   : > { %v2328_v52 = vadd.f32 %v2327_v61, %v2163_v26 }
 0x44b   : > { %v2329_v14 = vpop.f32.mrf.mxu1 }
 0x44c   : > { %v2330_v54 = vadd.f32 %v2329_v14, %v2163_v26  ;;  %v2457_v56 = vsub.f32 0.0, %v2328_v52 }
 0x44d   : > { %v2331_v48 = vpop.f32.mrf.mxu1 }
 0x44e   : > { %v2458_v46 = vsub.f32 0.0, %v2330_v54  ;;  %v2465_v21 = vmul.f32 1.442695, %v2457_v56 }
 0x44f   : > { %v2332_v29 = vpop.f32.mrf.mxu1 }
 0x450   : > { %v2467_v43 = vmul.f32 1.442695, %v2458_v46 }
 0x457   : > { %v2368_v4 = vpop.f32.mrf.mxu1 }
 0x458   : > { %v2369_v58 = vadd.f32 %v2368_v4, %v2163_v26  ;;  %v2522_v4 = vsub.s32 %v2519_v7, %v3443_v44 }
 0x459   : > { %v2370_v39 = vpop.f32.mrf.mxu1 }
 0x45a   : > { %v2371_v27 = vadd.f32 %v2370_v39, %v2163_v26  ;;  %v2459_v62 = vsub.f32 0.0, %v2369_v58 }
 0x45b   : > { %v2372_v37 = vpop.f32.mrf.mxu1 }
 0x45c   : > { %v2460_v20 = vsub.f32 0.0, %v2371_v27  ;;  %v2469_v33 = vmul.f32 1.442695, %v2459_v62 }
 0x45d   : > { %v2373_v55 = vpop.f32.mrf.mxu1 }
 0x45e   : > { %v2471_v23 = vmul.f32 1.442695, %v2460_v20 }
 0x460   : > { %2987 = vpow2.f32 %v2471_v23 }
 0x461   : > { %v2409_v28 = vpop.f32.mrf.mxu0  ;;  %2989 = vpow2.f32 %v2467_v43 }
 0x462   : > { %v2410_v49 = vadd.f32 %v2409_v28, %v2163_v26  ;;  %2991 = vpow2.f32 %v2469_v33 }
 0x463   : > { %v2411_v19 = vpop.f32.mrf.mxu0  ;;  %2993 = vpow2.f32 %v2465_v21 }
 0x464   : > { %v2461_v41 = vsub.f32 0.0, %v2410_v49  ;;  %v2412_v31 = vadd.f32 %v2411_v19, %v2163_v26 }
 0x465   : > { %v2413_v38 = vpop.f32.mrf.mxu0  ;;  %v2450_v9 = vpop.f32.mrf.mxu1 }
 0x466   : > { %v2473_v32 = vmul.f32 1.442695, %v2461_v41  ;;  %v2462_v15 = vsub.f32 0.0, %v2412_v31  ;;  %v2451_v5 = vadd.f32 %v2450_v9, %v2163_v26 }
 0x467   : > { %v2414_v10 = vpop.f32.mrf.mxu0  ;;  %v2452_v30 = vpop.f32.mrf.mxu1 }
 0x468   : > { %v2475_v36 = vmul.f32 1.442695, %v2462_v15  ;;  %v2463_v42 = vsub.f32 0.0, %v2451_v5  ;;  %v2453_v8 = vadd.f32 %v2452_v30, %v2163_v26  ;;  %2995 = vpow2.f32 %v2473_v32 }
 0x469   : > { %v2454_v24 = vpop.f32.mrf.mxu1 }
 0x46a   : > { %2997 = vpow2.f32 %v2475_v36  ;;  %v2477_v60 = vmul.f32 1.442695, %v2463_v42  ;;  %v2464_v11 = vsub.f32 0.0, %v2453_v8 }
 0x46b   : > { %v2455_v53 = vpop.f32.mrf.mxu1 }
 0x46c   : > { %v2479_v25 = vmul.f32 1.442695, %v2464_v11  ;;  %2999 = vpow2.f32 %v2477_v60 }
 0x46d   : > { %v2988_v51 = vpop.eup %2987 }
 0x46e   : > { %3001 = vpow2.f32 %v2479_v25  ;;  %v2990_v2 = vpop.eup %2989  ;;  %v2484_v0 = vadd.f32 1.0, %v2988_v51 }
 0x46f   : > { %v2992_v59 = vpop.eup %2991  ;;  %v2482_v40 = vadd.f32 1.0, %v2990_v2 }
 0x470   : > { %v2994_v13 = vpop.eup %2993  ;;  %v2483_v35 = vadd.f32 1.0, %v2992_v59  ;;  %3003 = vrcp.f32 %v2484_v0 }
 0x471   : > { %v2481_v16 = vadd.f32 1.0, %v2994_v13  ;;  %3005 = vrcp.f32 %v2482_v40 }
 0x472   : > { %3007 = vrcp.f32 %v2483_v35 }
 0x473   : > { %3009 = vrcp.f32 %v2481_v16 }
 0x475   : > { %v2996_v63 = vpop.eup %2995 }
 0x476   : > { %v2485_v18 = vadd.f32 1.0, %v2996_v63 }
 0x477   : > { %v2998_v57 = vpop.eup %2997 }
 0x478   : > { %v2486_v17 = vadd.f32 1.0, %v2998_v57 }
 0x479   : > { %v3000_v50 = vpop.eup %2999 }
 0x47a   : > { %3011 = vrcp.f32 %v2486_v17  ;;  %v2487_v22 = vadd.f32 1.0, %v3000_v50 }
 0x47b   : > { %v3002_v3 = vpop.eup %3001  ;;  %3013 = vrcp.f32 %v2485_v18 }
 0x47c   : > { %v2488_v1 = vadd.f32 1.0, %v3002_v3  ;;  %3015 = vrcp.f32 %v2487_v22 }
 0x47d   : > { %v3004_v12 = vpop.eup %3003 }
 0x47e   : > { %3017 = vrcp.f32 %v2488_v1  ;;  %v3006_v34 = vpop.eup %3005 }
 0x47f   : > { %v3008_v61 = vpop.eup %3007 }
 0x480   : > { %v3010_v14 = vpop.eup %3009  ;;  %v2514_v48 = vcombine.low %v3008_v61, %v3004_v12 }
 0x481   : > { %v2513_v6 = vcombine.low %v3010_v14, %v3006_v34 }
 0x482   : > { %v2530_v27 = vrot.slane %v2514_v48, %v2522_v4 }
 0x483   : > { %v2523_v52 = vrot.slane %v2513_v6, %v2522_v4 }
 0x485   : > { %v2545_v46 = vcombine.low %v2523_v52, %v2530_v27 }
 0x487   : > { %v3012_v29 = vpop.eup %3011  ;;  %v2553_v56 = vrot.slane %v2545_v46, %v2522_v4 }
 0x488   : > { %v3014_v26 = vpop.eup %3013 }
 0x489   : > { %v3016_v39 = vpop.eup %3015  ;;  %v2515_v54 = vcombine.low %v3014_v26, %v3012_v29 }
 0x48b   : > { %v3018_v58 = vpop.eup %3017  ;;  %v2537_v20 = vrot.slane %v2515_v54, %v2522_v4 }
 0x48c   : > { %v2516_v37 = vcombine.low %v3016_v39, %v3018_v58 }
 0x48e   : > { %v2544_v55 = vrot.slane %v2516_v37, %v2522_v4 }
 0x490   : > { %v2546_v62 = vcombine.low %v2537_v20, %v2544_v55 }
 0x492   : > { %v2560_v23 = vrot.slane %v2546_v62, %v2522_v4 }
 0x494   : > { %v2561_v44 = vcombine.low %v2553_v56, %v2560_v23 }
 0x496   : > { %2563 = vst [vmem:[%s367_s15] sm:$0xff] %v2561_v44 }
 0x497   : > { %3138 = shalt.err (!%p3135_p9)
}
 0x498   : > { %s3139_s14 = scalar_lea.hbm %s2577_s25, 128  ;;  %s3143_s26 = scalar_lea.hbm %s4156_s8, 256 }
 0x499   : > { %p3140_p13 = scmp.ne.s32.totalorder %s2577_s25, %s3139_s14  ;;  %p3144_p8 = scmp.lt.s32.totalorder %s2577_s25, %s4156_s8 }
 0x49a   : > { %p3145_p6 = scmp.lt.s32.totalorder %s3143_s26, %s3139_s14 }
 0x49b   : > { %p3141_p7 = pnand %p3140_p13, %p4190_p0 }
 0x49c   : > { %p3146_p11 = por %p3145_p6, %p3144_p8 }
 0x49d   : > { %p3142_p4 = pneg %p3141_p7 }
 0x49f   : > { %p3147_p12 = pnand %p3146_p11, %p3142_p4 }
 0x4a1   : > { %3150 = shalt.err (!%p3147_p12)
}
 0x4a2   : > { %2870 = dma.vmem_to_hbm [thread:$0]  (%p4190_p0), %s2580_s20, 128, %s2577_s25, %s2565_s23  }
 0x4a3 PF: > { %s2591_s19 = sand.u32 1, %s3185_s29   ;;  %p4191_p5 = scmp.ne.s32.totalorder %s4166_s13, 0 }
 0x4a4   : > { %p4192_p10 = scmp.ge.s32.totalorder %s3197_s10, 2  ;;  %s2592_s15 = scalar_lea.sflag [#allocation7], %s2591_s19 }
 0x4a6   : > { %p2887_p1 = pnand %p4192_p10, %p4191_p5 }
 0x4a8   : > { %p2888_p2 = pneg %p2887_p1 }
 0x4aa   : > { %3180 = dma.done.wait (%p2888_p2), %s2592_s15, 128  }
 0x4ab   : > { %3182 = vsyncadd (%p2888_p2), %s2592_s15, 4294967168  ;;  %p25_p3 = scmp.ge.s32.totalorder %s3344_s18, 4   ;;  %s4193_s29 = smov %s3189_s30 }
 0x4ac   : > { %s4194_s30 = smov %s3193_s9  ;;  %s4195_s9 = smov %s3362_s17 }
 0x4ad   : > { %s4196_s10 = smov %s3344_s18  ;;  %27 = sbr.rel (!%p25_p3) target bundleno = 10 (0xa), region = 109 }
 0x4b2   :  { %2597 = vsyncpa [#allocation6], 1 }
 0x4b3   :  { %2599 = vsyncpa [#allocation6 + $0x1], 1 }
 0x4b4   :  { %2600 = vsyncpa [#allocation9], 1 }
 0x4b5   :  { %2601 = vsyncpa [#allocation12], 1 }
 0x4b6   :  { %2602 = vsyncpa [#allocation7], 1 }
 0x4b7   :  { %2604 = vsyncpa [#allocation7 + $0x1], 1 }

</bundles_post_ra>
